<compile_context>
chip_gen: v7x
topology: tpu7x:2x2x1
jax: 0.10.0
libtpu: 0.0.40
codegen_flags: <defaults>
</compile_context>

<pallas_src>
import functools

import jax
import jax.numpy as jnp
from jax.experimental import pallas as pl
from jax.experimental.pallas import tpu as pltpu


def _lsr_topk_kernel(x_ref, t_ref, o_ref, *, k, eps, unroll):
    x = x_ref[...]                               # (T, C) logits, native dtype
    tgt = t_ref[...]                             # (T, 1) int32 targets
    T, C = x.shape

    # (1, C) column iota: broadcast over sublanes at compare time instead of
    # materializing / re-streaming a (T, C) int32 temp.
    col = jax.lax.broadcasted_iota(jnp.int32, (1, C), 1)

    # Single f32 pass: row max, log-sum-exp, and the target-column logit.
    xf = x.astype(jnp.float32)
    row_max = jnp.max(xf, axis=1, keepdims=True)                              # (T, 1)
    lse = jnp.log(jnp.sum(jnp.exp(xf - row_max), axis=1, keepdims=True))      # (T, 1)
    x_t = jnp.sum(jnp.where(col == tgt, xf, 0.0), axis=1, keepdims=True)      # (T, 1)

    neg_inf = jnp.asarray(-jnp.inf, dtype=x.dtype)
    big_c = jnp.int32(C)

    # Iterative top-k selection (first index on ties, matching torch.topk /
    # lax.top_k).  Accumulates:
    #   s_raw   = sum of the k selected raw logits (f32)
    #   in_topk = 1.0 if the target column was among the k selections
    def body(_, carry):
        work, s_raw, in_topk = carry
        rmax = jnp.max(work, axis=1, keepdims=True)                           # (T, 1)
        cand = jnp.where(work == rmax, col, big_c)                            # (T, C)
        first_idx = jnp.min(cand, axis=1, keepdims=True)                      # (T, 1)
        s_raw = s_raw + rmax.astype(jnp.float32)
        in_topk = jnp.maximum(in_topk, (first_idx == tgt).astype(jnp.float32))
        # cand == first_idx holds only at the winning position -> single wide
        # select per iteration (no second (T, C) compare against `col`).
        work = jnp.where(cand == first_idx, neg_inf, work)
        return work, s_raw, in_topk

    s0 = jnp.zeros((T, 1), jnp.float32)
    hit0 = jnp.zeros((T, 1), jnp.float32)
    _, s_raw, in_topk = jax.lax.fori_loop(0, k, body, (x, s0, hit0),
                                          unroll=unroll)

    # log_softmax[i, j] = x[i, j] - row_max_i - lse_i, applied to (T, 1) pieces.
    ls_t = x_t - row_max - lse                                                # (T, 1)
    sum_topk_ls = s_raw - jnp.float32(k) * (row_max + lse)                    # (T, 1)
    coef = jnp.float32(eps / k)
    loss_rows = -(coef * (sum_topk_ls - in_topk * ls_t)
                  + jnp.float32(1.0 - eps) * ls_t)                            # (T, 1)
    o_ref[...] = loss_rows


def _vmem_capacity_bytes():
    # Per-core VMEM (v5e/v6e: 128 MiB, v7x: 64 MiB).  Conservative fallback if
    # hardware info is unavailable.
    try:
        return int(pltpu.get_tpu_info().vmem_capacity_bytes)
    except Exception:
        return 64 * 1024 * 1024


def _pick_tile_rows(n, c, in_bytes):
    # Honest per-row footprint: double-buffered input tile (2*in_bytes*C),
    # the native-dtype `work` carry (in_bytes*C), one wide f32 temp (exp /
    # xf cast, 4*C), the int32 `cand` (4*C), and slack for compare masks
    # (4*C).  The (1, C) column iota is negligible.
    budget = int(_vmem_capacity_bytes() * 0.40)
    per_row = (3 * in_bytes + 12) * c
    t = budget // max(per_row, 1)
    min_rows = max(8, 32 // max(in_bytes, 1))     # 8 for f32, 16 for bf16, 32 for int8
    t = max(min_rows, min(1024, (t // 8) * 8))
    n_pad = ((n + min_rows - 1) // min_rows) * min_rows
    return int(min(t, n_pad))


def lsr_topk_loss(inputs, targets, epsilon=0.1, topk=16, tile_rows=None,
                  unroll=None):
    """inputs: (N, C) logits (any float dtype); targets: (N,) int labels. Returns scalar loss."""
    N, C = inputs.shape
    T = tile_rows if tile_rows is not None else _pick_tile_rows(
        N, C, inputs.dtype.itemsize)
    n_pad = ((N + T - 1) // T) * T

    x = inputs
    t2 = targets.astype(jnp.int32).reshape(N, 1)
    if n_pad != N:
        # Padded rows get zero logits / target 0; their losses are sliced off below.
        x = jnp.pad(x, ((0, n_pad - N), (0, 0)))
        t2 = jnp.pad(t2, ((0, n_pad - N), (0, 0)))

    if unroll is None:
        unroll = True if topk <= 32 else 8        # full unroll for small static k

    # ~65% of physical per-core VMEM as the Mosaic scoped limit (≈40 MiB on
    # v7x, ≈83 MiB on v5e/v6e) — headroom above the ≈40% tiling budget.
    vmem_limit = int(_vmem_capacity_bytes() * 0.65)

    # Full-C blocks: Mosaic masks the lane tail if C is not a multiple of 128.
    per_row = pl.pallas_call(
        functools.partial(_lsr_topk_kernel, k=topk, eps=epsilon, unroll=unroll),
        out_shape=jax.ShapeDtypeStruct((n_pad, 1), jnp.float32),
        grid=(n_pad // T,),
        in_specs=[
            pl.BlockSpec((T, C), lambda i: (i, 0)),
            pl.BlockSpec((T, 1), lambda i: (i, 0)),
        ],
        out_specs=pl.BlockSpec((T, 1), lambda i: (i, 0)),
        compiler_params=pltpu.CompilerParams(
            dimension_semantics=("parallel",),
            vmem_limit_bytes=vmem_limit,
        ),
    )(x, t2)

    return jnp.mean(per_row[:N, 0])


def _reference(inputs, targets, epsilon=0.1, topk=16):
    """Pure-JAX reference mirroring the PyTorch scatter semantics."""
    N, C = inputs.shape
    _, idx = jax.lax.top_k(inputs, topk)                          # (N, k)
    onehot = jnp.zeros((N, C), jnp.float32)
    rows = jnp.arange(N)[:, None]
    onehot = onehot.at[rows, idx].set(epsilon / topk)
    onehot = onehot.at[jnp.arange(N), targets].set(1.0 - epsilon)
    ls = jax.nn.log_softmax(inputs.astype(jnp.float32), axis=1)
    return jnp.mean(-jnp.sum(onehot * ls, axis=1))


if __name__ == "__main__":
    key = jax.random.PRNGKey(0)
    k_x, k_t, k_p, k_t2 = jax.random.split(key, 4)

    N, C = 24, 256         # small stand-in for the 39935-class original
    EPS, TOPK = 0.1, 16

    inputs = jax.random.normal(k_x, (N, C), dtype=jnp.float32)
    targets = jax.random.randint(k_t, (N,), 0, C, dtype=jnp.int32)

    # Multi-tile path (explicit 8-row tiles -> 3 grid steps).
    loss = lsr_topk_loss(inputs, targets, epsilon=EPS, topk=TOPK, tile_rows=8)
    loss = jax.block_until_ready(loss)
    ref = _reference(inputs, targets, epsilon=EPS, topk=TOPK)
    assert jnp.allclose(loss, ref, atol=1e-5, rtol=1e-5), (loss, ref)

    # Auto-tile + row-padding path (N not a multiple of the chosen tile).
    loss2 = lsr_topk_loss(inputs[:20], targets[:20], epsilon=EPS, topk=TOPK)
    loss2 = jax.block_until_ready(loss2)
    ref2 = _reference(inputs[:20], targets[:20], epsilon=EPS, topk=TOPK)
    assert jnp.allclose(loss2, ref2, atol=1e-5, rtol=1e-5), (loss2, ref2)

    # bf16 path: selection loop stays in bf16 (half the vld bytes in the k-loop).
    # Per-row values are made distinct so tie-breaking cannot differ from lax.top_k.
    base = jnp.linspace(-4.0, 4.0, C, dtype=jnp.float32)
    xb = jax.random.permutation(k_p, jnp.tile(base[None, :], (N, 1)),
                                axis=1, independent=True).astype(jnp.bfloat16)
    tb = jax.random.randint(k_t2, (N,), 0, C, dtype=jnp.int32)
    loss3 = lsr_topk_loss(xb, tb, epsilon=EPS, topk=TOPK, tile_rows=16)
    loss3 = jax.block_until_ready(loss3)
    ref3 = _reference(xb, tb, epsilon=EPS, topk=TOPK)
    assert jnp.allclose(loss3, ref3, atol=1e-4, rtol=1e-4), (loss3, ref3)

    print("KERNEL_OK")
</pallas_src>

<mosaic_0001>
module attributes {stable_mosaic.version = 11 : i64} {
  func.func @_lsr_topk_kernel(%arg0: i32, %arg1: memref<8x256xf32, #tpu.memory_space<vmem>>, %arg2: memref<8x1xi32, #tpu.memory_space<vmem>>, %arg3: memref<8x1xf32, #tpu.memory_space<vmem>>) attributes {dimension_semantics = [#tpu.dimension_semantics<parallel>], iteration_bounds = array<i64: 3>, scalar_prefetch = 0 : i64, scratch_operands = 0 : i64, tpu.core_type = #tpu.core_type<tc>, window_params = [{transform_indices = @transform_0, window_bounds = array<i64: 8, 256>}, {transform_indices = @transform_1, window_bounds = array<i64: 8, 1>}, {transform_indices = @transform_2, window_bounds = array<i64: 8, 1>}]} {
    %c0 = arith.constant 0 : index
    %c0_0 = arith.constant 0 : index
    %0 = vector.load %arg1[%c0, %c0_0] : memref<8x256xf32, #tpu.memory_space<vmem>>, vector<8x256xf32>
    %c0_1 = arith.constant 0 : index
    %c0_2 = arith.constant 0 : index
    %1 = vector.load %arg2[%c0_1, %c0_2] : memref<8x1xi32, #tpu.memory_space<vmem>>, vector<8x1xi32>
    %2 = tpu.iota {dimensions = array<i32: 1>} : vector<1x256xi32>
    %cst = arith.constant dense<0xFF800000> : vector<8xf32>
    %3 = vector.multi_reduction <maximumf>, %0, %cst [1] : vector<8x256xf32> to vector<8xf32>
    %4 = vector.shape_cast %3 : vector<8xf32> to vector<8x1xf32>
    %5 = vector.broadcast %4 : vector<8x1xf32> to vector<8x256xf32>
    %6 = arith.subf %0, %5 : vector<8x256xf32>
    %7 = math.exp %6 : vector<8x256xf32>
    %cst_3 = arith.constant dense<0.000000e+00> : vector<8xf32>
    %8 = vector.multi_reduction <add>, %7, %cst_3 [1] : vector<8x256xf32> to vector<8xf32>
    %9 = vector.shape_cast %8 : vector<8xf32> to vector<8x1xf32>
    %10 = math.log %9 : vector<8x1xf32>
    %11 = vector.broadcast %2 : vector<1x256xi32> to vector<8x256xi32>
    %12 = vector.broadcast %1 : vector<8x1xi32> to vector<8x256xi32>
    %13 = arith.cmpi eq, %11, %12 : vector<8x256xi32>
    %cst_4 = arith.constant 0.000000e+00 : f32
    %14 = vector.broadcast %cst_4 : f32 to vector<8x256xf32>
    %15 = arith.select %13, %0, %14 : vector<8x256xi1>, vector<8x256xf32>
    %cst_5 = arith.constant dense<0.000000e+00> : vector<8xf32>
    %16 = vector.multi_reduction <add>, %15, %cst_5 [1] : vector<8x256xf32> to vector<8xf32>
    %17 = vector.shape_cast %16 : vector<8xf32> to vector<8x1xf32>
    %cst_6 = arith.constant 0.000000e+00 : f32
    %18 = vector.broadcast %cst_6 : f32 to vector<8x1xf32>
    %cst_7 = arith.constant 0.000000e+00 : f32
    %19 = vector.broadcast %cst_7 : f32 to vector<8x1xf32>
    %c256_i32 = arith.constant 256 : i32
    %cst_8 = arith.constant 0xFF800000 : f32
    %c0_i32 = arith.constant 0 : i32
    %cst_9 = arith.constant dense<0xFF800000> : vector<8xf32>
    %20 = vector.multi_reduction <maximumf>, %0, %cst_9 [1] : vector<8x256xf32> to vector<8xf32>
    %21 = vector.shape_cast %20 : vector<8xf32> to vector<8x1xf32>
    %22 = vector.broadcast %21 : vector<8x1xf32> to vector<8x256xf32>
    %23 = arith.cmpf oeq, %0, %22 : vector<8x256xf32>
    %24 = vector.shape_cast %2 : vector<1x256xi32> to vector<1x256xi32>
    %25 = vector.broadcast %24 : vector<1x256xi32> to vector<8x256xi32>
    %26 = vector.broadcast %c256_i32 : i32 to vector<8x256xi32>
    %27 = arith.select %23, %25, %26 : vector<8x256xi1>, vector<8x256xi32>
    %cst_10 = arith.constant dense<2147483647> : vector<8xi32>
    %28 = vector.multi_reduction <minsi>, %27, %cst_10 [1] : vector<8x256xi32> to vector<8xi32>
    %29 = vector.shape_cast %28 : vector<8xi32> to vector<8x1xi32>
    %30 = arith.addf %18, %21 : vector<8x1xf32>
    %31 = arith.cmpi eq, %29, %1 : vector<8x1xi32>
    %32 = arith.extui %31 : vector<8x1xi1> to vector<8x1xi32>
    %33 = arith.sitofp %32 : vector<8x1xi32> to vector<8x1xf32>
    %34 = arith.maximumf %19, %33 : vector<8x1xf32>
    %35 = vector.broadcast %29 : vector<8x1xi32> to vector<8x256xi32>
    %36 = arith.cmpi eq, %27, %35 : vector<8x256xi32>
    %37 = vector.broadcast %cst_8 : f32 to vector<8x256xf32>
    %38 = arith.select %36, %37, %0 : vector<8x256xi1>, vector<8x256xf32>
    %c1_i32 = arith.constant 1 : i32
    %cst_11 = arith.constant dense<0xFF800000> : vector<8xf32>
    %39 = vector.multi_reduction <maximumf>, %38, %cst_11 [1] : vector<8x256xf32> to vector<8xf32>
    %40 = vector.shape_cast %39 : vector<8xf32> to vector<8x1xf32>
    %41 = vector.broadcast %40 : vector<8x1xf32> to vector<8x256xf32>
    %42 = arith.cmpf oeq, %38, %41 : vector<8x256xf32>
    %43 = vector.shape_cast %2 : vector<1x256xi32> to vector<1x256xi32>
    %44 = vector.broadcast %43 : vector<1x256xi32> to vector<8x256xi32>
    %45 = vector.broadcast %c256_i32 : i32 to vector<8x256xi32>
    %46 = arith.select %42, %44, %45 : vector<8x256xi1>, vector<8x256xi32>
    %cst_12 = arith.constant dense<2147483647> : vector<8xi32>
    %47 = vector.multi_reduction <minsi>, %46, %cst_12 [1] : vector<8x256xi32> to vector<8xi32>
    %48 = vector.shape_cast %47 : vector<8xi32> to vector<8x1xi32>
    %49 = arith.addf %30, %40 : vector<8x1xf32>
    %50 = arith.cmpi eq, %48, %1 : vector<8x1xi32>
    %51 = arith.extui %50 : vector<8x1xi1> to vector<8x1xi32>
    %52 = arith.sitofp %51 : vector<8x1xi32> to vector<8x1xf32>
    %53 = arith.maximumf %34, %52 : vector<8x1xf32>
    %54 = vector.broadcast %48 : vector<8x1xi32> to vector<8x256xi32>
    %55 = arith.cmpi eq, %46, %54 : vector<8x256xi32>
    %56 = vector.broadcast %cst_8 : f32 to vector<8x256xf32>
    %57 = arith.select %55, %56, %38 : vector<8x256xi1>, vector<8x256xf32>
    %c2_i32 = arith.constant 2 : i32
    %cst_13 = arith.constant dense<0xFF800000> : vector<8xf32>
    %58 = vector.multi_reduction <maximumf>, %57, %cst_13 [1] : vector<8x256xf32> to vector<8xf32>
    %59 = vector.shape_cast %58 : vector<8xf32> to vector<8x1xf32>
    %60 = vector.broadcast %59 : vector<8x1xf32> to vector<8x256xf32>
    %61 = arith.cmpf oeq, %57, %60 : vector<8x256xf32>
    %62 = vector.shape_cast %2 : vector<1x256xi32> to vector<1x256xi32>
    %63 = vector.broadcast %62 : vector<1x256xi32> to vector<8x256xi32>
    %64 = vector.broadcast %c256_i32 : i32 to vector<8x256xi32>
    %65 = arith.select %61, %63, %64 : vector<8x256xi1>, vector<8x256xi32>
    %cst_14 = arith.constant dense<2147483647> : vector<8xi32>
    %66 = vector.multi_reduction <minsi>, %65, %cst_14 [1] : vector<8x256xi32> to vector<8xi32>
    %67 = vector.shape_cast %66 : vector<8xi32> to vector<8x1xi32>
    %68 = arith.addf %49, %59 : vector<8x1xf32>
    %69 = arith.cmpi eq, %67, %1 : vector<8x1xi32>
    %70 = arith.extui %69 : vector<8x1xi1> to vector<8x1xi32>
    %71 = arith.sitofp %70 : vector<8x1xi32> to vector<8x1xf32>
    %72 = arith.maximumf %53, %71 : vector<8x1xf32>
    %73 = vector.broadcast %67 : vector<8x1xi32> to vector<8x256xi32>
    %74 = arith.cmpi eq, %65, %73 : vector<8x256xi32>
    %75 = vector.broadcast %cst_8 : f32 to vector<8x256xf32>
    %76 = arith.select %74, %75, %57 : vector<8x256xi1>, vector<8x256xf32>
    %c3_i32 = arith.constant 3 : i32
    %cst_15 = arith.constant dense<0xFF800000> : vector<8xf32>
    %77 = vector.multi_reduction <maximumf>, %76, %cst_15 [1] : vector<8x256xf32> to vector<8xf32>
    %78 = vector.shape_cast %77 : vector<8xf32> to vector<8x1xf32>
    %79 = vector.broadcast %78 : vector<8x1xf32> to vector<8x256xf32>
    %80 = arith.cmpf oeq, %76, %79 : vector<8x256xf32>
    %81 = vector.shape_cast %2 : vector<1x256xi32> to vector<1x256xi32>
    %82 = vector.broadcast %81 : vector<1x256xi32> to vector<8x256xi32>
    %83 = vector.broadcast %c256_i32 : i32 to vector<8x256xi32>
    %84 = arith.select %80, %82, %83 : vector<8x256xi1>, vector<8x256xi32>
    %cst_16 = arith.constant dense<2147483647> : vector<8xi32>
    %85 = vector.multi_reduction <minsi>, %84, %cst_16 [1] : vector<8x256xi32> to vector<8xi32>
    %86 = vector.shape_cast %85 : vector<8xi32> to vector<8x1xi32>
    %87 = arith.addf %68, %78 : vector<8x1xf32>
    %88 = arith.cmpi eq, %86, %1 : vector<8x1xi32>
    %89 = arith.extui %88 : vector<8x1xi1> to vector<8x1xi32>
    %90 = arith.sitofp %89 : vector<8x1xi32> to vector<8x1xf32>
    %91 = arith.maximumf %72, %90 : vector<8x1xf32>
    %92 = vector.broadcast %86 : vector<8x1xi32> to vector<8x256xi32>
    %93 = arith.cmpi eq, %84, %92 : vector<8x256xi32>
    %94 = vector.broadcast %cst_8 : f32 to vector<8x256xf32>
    %95 = arith.select %93, %94, %76 : vector<8x256xi1>, vector<8x256xf32>
    %c4_i32 = arith.constant 4 : i32
    %cst_17 = arith.constant dense<0xFF800000> : vector<8xf32>
    %96 = vector.multi_reduction <maximumf>, %95, %cst_17 [1] : vector<8x256xf32> to vector<8xf32>
    %97 = vector.shape_cast %96 : vector<8xf32> to vector<8x1xf32>
    %98 = vector.broadcast %97 : vector<8x1xf32> to vector<8x256xf32>
    %99 = arith.cmpf oeq, %95, %98 : vector<8x256xf32>
    %100 = vector.shape_cast %2 : vector<1x256xi32> to vector<1x256xi32>
    %101 = vector.broadcast %100 : vector<1x256xi32> to vector<8x256xi32>
    %102 = vector.broadcast %c256_i32 : i32 to vector<8x256xi32>
    %103 = arith.select %99, %101, %102 : vector<8x256xi1>, vector<8x256xi32>
    %cst_18 = arith.constant dense<2147483647> : vector<8xi32>
    %104 = vector.multi_reduction <minsi>, %103, %cst_18 [1] : vector<8x256xi32> to vector<8xi32>
    %105 = vector.shape_cast %104 : vector<8xi32> to vector<8x1xi32>
    %106 = arith.addf %87, %97 : vector<8x1xf32>
    %107 = arith.cmpi eq, %105, %1 : vector<8x1xi32>
    %108 = arith.extui %107 : vector<8x1xi1> to vector<8x1xi32>
    %109 = arith.sitofp %108 : vector<8x1xi32> to vector<8x1xf32>
    %110 = arith.maximumf %91, %109 : vector<8x1xf32>
    %111 = vector.broadcast %105 : vector<8x1xi32> to vector<8x256xi32>
    %112 = arith.cmpi eq, %103, %111 : vector<8x256xi32>
    %113 = vector.broadcast %cst_8 : f32 to vector<8x256xf32>
    %114 = arith.select %112, %113, %95 : vector<8x256xi1>, vector<8x256xf32>
    %c5_i32 = arith.constant 5 : i32
    %cst_19 = arith.constant dense<0xFF800000> : vector<8xf32>
    %115 = vector.multi_reduction <maximumf>, %114, %cst_19 [1] : vector<8x256xf32> to vector<8xf32>
    %116 = vector.shape_cast %115 : vector<8xf32> to vector<8x1xf32>
    %117 = vector.broadcast %116 : vector<8x1xf32> to vector<8x256xf32>
    %118 = arith.cmpf oeq, %114, %117 : vector<8x256xf32>
    %119 = vector.shape_cast %2 : vector<1x256xi32> to vector<1x256xi32>
    %120 = vector.broadcast %119 : vector<1x256xi32> to vector<8x256xi32>
    %121 = vector.broadcast %c256_i32 : i32 to vector<8x256xi32>
    %122 = arith.select %118, %120, %121 : vector<8x256xi1>, vector<8x256xi32>
    %cst_20 = arith.constant dense<2147483647> : vector<8xi32>
    %123 = vector.multi_reduction <minsi>, %122, %cst_20 [1] : vector<8x256xi32> to vector<8xi32>
    %124 = vector.shape_cast %123 : vector<8xi32> to vector<8x1xi32>
    %125 = arith.addf %106, %116 : vector<8x1xf32>
    %126 = arith.cmpi eq, %124, %1 : vector<8x1xi32>
    %127 = arith.extui %126 : vector<8x1xi1> to vector<8x1xi32>
    %128 = arith.sitofp %127 : vector<8x1xi32> to vector<8x1xf32>
    %129 = arith.maximumf %110, %128 : vector<8x1xf32>
    %130 = vector.broadcast %124 : vector<8x1xi32> to vector<8x256xi32>
    %131 = arith.cmpi eq, %122, %130 : vector<8x256xi32>
    %132 = vector.broadcast %cst_8 : f32 to vector<8x256xf32>
    %133 = arith.select %131, %132, %114 : vector<8x256xi1>, vector<8x256xf32>
    %c6_i32 = arith.constant 6 : i32
    %cst_21 = arith.constant dense<0xFF800000> : vector<8xf32>
    %134 = vector.multi_reduction <maximumf>, %133, %cst_21 [1] : vector<8x256xf32> to vector<8xf32>
    %135 = vector.shape_cast %134 : vector<8xf32> to vector<8x1xf32>
    %136 = vector.broadcast %135 : vector<8x1xf32> to vector<8x256xf32>
    %137 = arith.cmpf oeq, %133, %136 : vector<8x256xf32>
    %138 = vector.shape_cast %2 : vector<1x256xi32> to vector<1x256xi32>
    %139 = vector.broadcast %138 : vector<1x256xi32> to vector<8x256xi32>
    %140 = vector.broadcast %c256_i32 : i32 to vector<8x256xi32>
    %141 = arith.select %137, %139, %140 : vector<8x256xi1>, vector<8x256xi32>
    %cst_22 = arith.constant dense<2147483647> : vector<8xi32>
    %142 = vector.multi_reduction <minsi>, %141, %cst_22 [1] : vector<8x256xi32> to vector<8xi32>
    %143 = vector.shape_cast %142 : vector<8xi32> to vector<8x1xi32>
    %144 = arith.addf %125, %135 : vector<8x1xf32>
    %145 = arith.cmpi eq, %143, %1 : vector<8x1xi32>
    %146 = arith.extui %145 : vector<8x1xi1> to vector<8x1xi32>
    %147 = arith.sitofp %146 : vector<8x1xi32> to vector<8x1xf32>
    %148 = arith.maximumf %129, %147 : vector<8x1xf32>
    %149 = vector.broadcast %143 : vector<8x1xi32> to vector<8x256xi32>
    %150 = arith.cmpi eq, %141, %149 : vector<8x256xi32>
    %151 = vector.broadcast %cst_8 : f32 to vector<8x256xf32>
    %152 = arith.select %150, %151, %133 : vector<8x256xi1>, vector<8x256xf32>
    %c7_i32 = arith.constant 7 : i32
    %cst_23 = arith.constant dense<0xFF800000> : vector<8xf32>
    %153 = vector.multi_reduction <maximumf>, %152, %cst_23 [1] : vector<8x256xf32> to vector<8xf32>
    %154 = vector.shape_cast %153 : vector<8xf32> to vector<8x1xf32>
    %155 = vector.broadcast %154 : vector<8x1xf32> to vector<8x256xf32>
    %156 = arith.cmpf oeq, %152, %155 : vector<8x256xf32>
    %157 = vector.shape_cast %2 : vector<1x256xi32> to vector<1x256xi32>
    %158 = vector.broadcast %157 : vector<1x256xi32> to vector<8x256xi32>
    %159 = vector.broadcast %c256_i32 : i32 to vector<8x256xi32>
    %160 = arith.select %156, %158, %159 : vector<8x256xi1>, vector<8x256xi32>
    %cst_24 = arith.constant dense<2147483647> : vector<8xi32>
    %161 = vector.multi_reduction <minsi>, %160, %cst_24 [1] : vector<8x256xi32> to vector<8xi32>
    %162 = vector.shape_cast %161 : vector<8xi32> to vector<8x1xi32>
    %163 = arith.addf %144, %154 : vector<8x1xf32>
    %164 = arith.cmpi eq, %162, %1 : vector<8x1xi32>
    %165 = arith.extui %164 : vector<8x1xi1> to vector<8x1xi32>
    %166 = arith.sitofp %165 : vector<8x1xi32> to vector<8x1xf32>
    %167 = arith.maximumf %148, %166 : vector<8x1xf32>
    %168 = vector.broadcast %162 : vector<8x1xi32> to vector<8x256xi32>
    %169 = arith.cmpi eq, %160, %168 : vector<8x256xi32>
    %170 = vector.broadcast %cst_8 : f32 to vector<8x256xf32>
    %171 = arith.select %169, %170, %152 : vector<8x256xi1>, vector<8x256xf32>
    %c8_i32 = arith.constant 8 : i32
    %cst_25 = arith.constant dense<0xFF800000> : vector<8xf32>
    %172 = vector.multi_reduction <maximumf>, %171, %cst_25 [1] : vector<8x256xf32> to vector<8xf32>
    %173 = vector.shape_cast %172 : vector<8xf32> to vector<8x1xf32>
    %174 = vector.broadcast %173 : vector<8x1xf32> to vector<8x256xf32>
    %175 = arith.cmpf oeq, %171, %174 : vector<8x256xf32>
    %176 = vector.shape_cast %2 : vector<1x256xi32> to vector<1x256xi32>
    %177 = vector.broadcast %176 : vector<1x256xi32> to vector<8x256xi32>
    %178 = vector.broadcast %c256_i32 : i32 to vector<8x256xi32>
    %179 = arith.select %175, %177, %178 : vector<8x256xi1>, vector<8x256xi32>
    %cst_26 = arith.constant dense<2147483647> : vector<8xi32>
    %180 = vector.multi_reduction <minsi>, %179, %cst_26 [1] : vector<8x256xi32> to vector<8xi32>
    %181 = vector.shape_cast %180 : vector<8xi32> to vector<8x1xi32>
    %182 = arith.addf %163, %173 : vector<8x1xf32>
    %183 = arith.cmpi eq, %181, %1 : vector<8x1xi32>
    %184 = arith.extui %183 : vector<8x1xi1> to vector<8x1xi32>
    %185 = arith.sitofp %184 : vector<8x1xi32> to vector<8x1xf32>
    %186 = arith.maximumf %167, %185 : vector<8x1xf32>
    %187 = vector.broadcast %181 : vector<8x1xi32> to vector<8x256xi32>
    %188 = arith.cmpi eq, %179, %187 : vector<8x256xi32>
    %189 = vector.broadcast %cst_8 : f32 to vector<8x256xf32>
    %190 = arith.select %188, %189, %171 : vector<8x256xi1>, vector<8x256xf32>
    %c9_i32 = arith.constant 9 : i32
    %cst_27 = arith.constant dense<0xFF800000> : vector<8xf32>
    %191 = vector.multi_reduction <maximumf>, %190, %cst_27 [1] : vector<8x256xf32> to vector<8xf32>
    %192 = vector.shape_cast %191 : vector<8xf32> to vector<8x1xf32>
    %193 = vector.broadcast %192 : vector<8x1xf32> to vector<8x256xf32>
    %194 = arith.cmpf oeq, %190, %193 : vector<8x256xf32>
    %195 = vector.shape_cast %2 : vector<1x256xi32> to vector<1x256xi32>
    %196 = vector.broadcast %195 : vector<1x256xi32> to vector<8x256xi32>
    %197 = vector.broadcast %c256_i32 : i32 to vector<8x256xi32>
    %198 = arith.select %194, %196, %197 : vector<8x256xi1>, vector<8x256xi32>
    %cst_28 = arith.constant dense<2147483647> : vector<8xi32>
    %199 = vector.multi_reduction <minsi>, %198, %cst_28 [1] : vector<8x256xi32> to vector<8xi32>
    %200 = vector.shape_cast %199 : vector<8xi32> to vector<8x1xi32>
    %201 = arith.addf %182, %192 : vector<8x1xf32>
    %202 = arith.cmpi eq, %200, %1 : vector<8x1xi32>
    %203 = arith.extui %202 : vector<8x1xi1> to vector<8x1xi32>
    %204 = arith.sitofp %203 : vector<8x1xi32> to vector<8x1xf32>
    %205 = arith.maximumf %186, %204 : vector<8x1xf32>
    %206 = vector.broadcast %200 : vector<8x1xi32> to vector<8x256xi32>
    %207 = arith.cmpi eq, %198, %206 : vector<8x256xi32>
    %208 = vector.broadcast %cst_8 : f32 to vector<8x256xf32>
    %209 = arith.select %207, %208, %190 : vector<8x256xi1>, vector<8x256xf32>
    %c10_i32 = arith.constant 10 : i32
    %cst_29 = arith.constant dense<0xFF800000> : vector<8xf32>
    %210 = vector.multi_reduction <maximumf>, %209, %cst_29 [1] : vector<8x256xf32> to vector<8xf32>
    %211 = vector.shape_cast %210 : vector<8xf32> to vector<8x1xf32>
    %212 = vector.broadcast %211 : vector<8x1xf32> to vector<8x256xf32>
    %213 = arith.cmpf oeq, %209, %212 : vector<8x256xf32>
    %214 = vector.shape_cast %2 : vector<1x256xi32> to vector<1x256xi32>
    %215 = vector.broadcast %214 : vector<1x256xi32> to vector<8x256xi32>
    %216 = vector.broadcast %c256_i32 : i32 to vector<8x256xi32>
    %217 = arith.select %213, %215, %216 : vector<8x256xi1>, vector<8x256xi32>
    %cst_30 = arith.constant dense<2147483647> : vector<8xi32>
    %218 = vector.multi_reduction <minsi>, %217, %cst_30 [1] : vector<8x256xi32> to vector<8xi32>
    %219 = vector.shape_cast %218 : vector<8xi32> to vector<8x1xi32>
    %220 = arith.addf %201, %211 : vector<8x1xf32>
    %221 = arith.cmpi eq, %219, %1 : vector<8x1xi32>
    %222 = arith.extui %221 : vector<8x1xi1> to vector<8x1xi32>
    %223 = arith.sitofp %222 : vector<8x1xi32> to vector<8x1xf32>
    %224 = arith.maximumf %205, %223 : vector<8x1xf32>
    %225 = vector.broadcast %219 : vector<8x1xi32> to vector<8x256xi32>
    %226 = arith.cmpi eq, %217, %225 : vector<8x256xi32>
    %227 = vector.broadcast %cst_8 : f32 to vector<8x256xf32>
    %228 = arith.select %226, %227, %209 : vector<8x256xi1>, vector<8x256xf32>
    %c11_i32 = arith.constant 11 : i32
    %cst_31 = arith.constant dense<0xFF800000> : vector<8xf32>
    %229 = vector.multi_reduction <maximumf>, %228, %cst_31 [1] : vector<8x256xf32> to vector<8xf32>
    %230 = vector.shape_cast %229 : vector<8xf32> to vector<8x1xf32>
    %231 = vector.broadcast %230 : vector<8x1xf32> to vector<8x256xf32>
    %232 = arith.cmpf oeq, %228, %231 : vector<8x256xf32>
    %233 = vector.shape_cast %2 : vector<1x256xi32> to vector<1x256xi32>
    %234 = vector.broadcast %233 : vector<1x256xi32> to vector<8x256xi32>
    %235 = vector.broadcast %c256_i32 : i32 to vector<8x256xi32>
    %236 = arith.select %232, %234, %235 : vector<8x256xi1>, vector<8x256xi32>
    %cst_32 = arith.constant dense<2147483647> : vector<8xi32>
    %237 = vector.multi_reduction <minsi>, %236, %cst_32 [1] : vector<8x256xi32> to vector<8xi32>
    %238 = vector.shape_cast %237 : vector<8xi32> to vector<8x1xi32>
    %239 = arith.addf %220, %230 : vector<8x1xf32>
    %240 = arith.cmpi eq, %238, %1 : vector<8x1xi32>
    %241 = arith.extui %240 : vector<8x1xi1> to vector<8x1xi32>
    %242 = arith.sitofp %241 : vector<8x1xi32> to vector<8x1xf32>
    %243 = arith.maximumf %224, %242 : vector<8x1xf32>
    %244 = vector.broadcast %238 : vector<8x1xi32> to vector<8x256xi32>
    %245 = arith.cmpi eq, %236, %244 : vector<8x256xi32>
    %246 = vector.broadcast %cst_8 : f32 to vector<8x256xf32>
    %247 = arith.select %245, %246, %228 : vector<8x256xi1>, vector<8x256xf32>
    %c12_i32 = arith.constant 12 : i32
    %cst_33 = arith.constant dense<0xFF800000> : vector<8xf32>
    %248 = vector.multi_reduction <maximumf>, %247, %cst_33 [1] : vector<8x256xf32> to vector<8xf32>
    %249 = vector.shape_cast %248 : vector<8xf32> to vector<8x1xf32>
    %250 = vector.broadcast %249 : vector<8x1xf32> to vector<8x256xf32>
    %251 = arith.cmpf oeq, %247, %250 : vector<8x256xf32>
    %252 = vector.shape_cast %2 : vector<1x256xi32> to vector<1x256xi32>
    %253 = vector.broadcast %252 : vector<1x256xi32> to vector<8x256xi32>
    %254 = vector.broadcast %c256_i32 : i32 to vector<8x256xi32>
    %255 = arith.select %251, %253, %254 : vector<8x256xi1>, vector<8x256xi32>
    %cst_34 = arith.constant dense<2147483647> : vector<8xi32>
    %256 = vector.multi_reduction <minsi>, %255, %cst_34 [1] : vector<8x256xi32> to vector<8xi32>
    %257 = vector.shape_cast %256 : vector<8xi32> to vector<8x1xi32>
    %258 = arith.addf %239, %249 : vector<8x1xf32>
    %259 = arith.cmpi eq, %257, %1 : vector<8x1xi32>
    %260 = arith.extui %259 : vector<8x1xi1> to vector<8x1xi32>
    %261 = arith.sitofp %260 : vector<8x1xi32> to vector<8x1xf32>
    %262 = arith.maximumf %243, %261 : vector<8x1xf32>
    %263 = vector.broadcast %257 : vector<8x1xi32> to vector<8x256xi32>
    %264 = arith.cmpi eq, %255, %263 : vector<8x256xi32>
    %265 = vector.broadcast %cst_8 : f32 to vector<8x256xf32>
    %266 = arith.select %264, %265, %247 : vector<8x256xi1>, vector<8x256xf32>
    %c13_i32 = arith.constant 13 : i32
    %cst_35 = arith.constant dense<0xFF800000> : vector<8xf32>
    %267 = vector.multi_reduction <maximumf>, %266, %cst_35 [1] : vector<8x256xf32> to vector<8xf32>
    %268 = vector.shape_cast %267 : vector<8xf32> to vector<8x1xf32>
    %269 = vector.broadcast %268 : vector<8x1xf32> to vector<8x256xf32>
    %270 = arith.cmpf oeq, %266, %269 : vector<8x256xf32>
    %271 = vector.shape_cast %2 : vector<1x256xi32> to vector<1x256xi32>
    %272 = vector.broadcast %271 : vector<1x256xi32> to vector<8x256xi32>
    %273 = vector.broadcast %c256_i32 : i32 to vector<8x256xi32>
    %274 = arith.select %270, %272, %273 : vector<8x256xi1>, vector<8x256xi32>
    %cst_36 = arith.constant dense<2147483647> : vector<8xi32>
    %275 = vector.multi_reduction <minsi>, %274, %cst_36 [1] : vector<8x256xi32> to vector<8xi32>
    %276 = vector.shape_cast %275 : vector<8xi32> to vector<8x1xi32>
    %277 = arith.addf %258, %268 : vector<8x1xf32>
    %278 = arith.cmpi eq, %276, %1 : vector<8x1xi32>
    %279 = arith.extui %278 : vector<8x1xi1> to vector<8x1xi32>
    %280 = arith.sitofp %279 : vector<8x1xi32> to vector<8x1xf32>
    %281 = arith.maximumf %262, %280 : vector<8x1xf32>
    %282 = vector.broadcast %276 : vector<8x1xi32> to vector<8x256xi32>
    %283 = arith.cmpi eq, %274, %282 : vector<8x256xi32>
    %284 = vector.broadcast %cst_8 : f32 to vector<8x256xf32>
    %285 = arith.select %283, %284, %266 : vector<8x256xi1>, vector<8x256xf32>
    %c14_i32 = arith.constant 14 : i32
    %cst_37 = arith.constant dense<0xFF800000> : vector<8xf32>
    %286 = vector.multi_reduction <maximumf>, %285, %cst_37 [1] : vector<8x256xf32> to vector<8xf32>
    %287 = vector.shape_cast %286 : vector<8xf32> to vector<8x1xf32>
    %288 = vector.broadcast %287 : vector<8x1xf32> to vector<8x256xf32>
    %289 = arith.cmpf oeq, %285, %288 : vector<8x256xf32>
    %290 = vector.shape_cast %2 : vector<1x256xi32> to vector<1x256xi32>
    %291 = vector.broadcast %290 : vector<1x256xi32> to vector<8x256xi32>
    %292 = vector.broadcast %c256_i32 : i32 to vector<8x256xi32>
    %293 = arith.select %289, %291, %292 : vector<8x256xi1>, vector<8x256xi32>
    %cst_38 = arith.constant dense<2147483647> : vector<8xi32>
    %294 = vector.multi_reduction <minsi>, %293, %cst_38 [1] : vector<8x256xi32> to vector<8xi32>
    %295 = vector.shape_cast %294 : vector<8xi32> to vector<8x1xi32>
    %296 = arith.addf %277, %287 : vector<8x1xf32>
    %297 = arith.cmpi eq, %295, %1 : vector<8x1xi32>
    %298 = arith.extui %297 : vector<8x1xi1> to vector<8x1xi32>
    %299 = arith.sitofp %298 : vector<8x1xi32> to vector<8x1xf32>
    %300 = arith.maximumf %281, %299 : vector<8x1xf32>
    %301 = vector.broadcast %295 : vector<8x1xi32> to vector<8x256xi32>
    %302 = arith.cmpi eq, %293, %301 : vector<8x256xi32>
    %303 = vector.broadcast %cst_8 : f32 to vector<8x256xf32>
    %304 = arith.select %302, %303, %285 : vector<8x256xi1>, vector<8x256xf32>
    %c15_i32 = arith.constant 15 : i32
    %cst_39 = arith.constant dense<0xFF800000> : vector<8xf32>
    %305 = vector.multi_reduction <maximumf>, %304, %cst_39 [1] : vector<8x256xf32> to vector<8xf32>
    %306 = vector.shape_cast %305 : vector<8xf32> to vector<8x1xf32>
    %307 = vector.broadcast %306 : vector<8x1xf32> to vector<8x256xf32>
    %308 = arith.cmpf oeq, %304, %307 : vector<8x256xf32>
    %309 = vector.shape_cast %2 : vector<1x256xi32> to vector<1x256xi32>
    %310 = vector.broadcast %309 : vector<1x256xi32> to vector<8x256xi32>
    %311 = vector.broadcast %c256_i32 : i32 to vector<8x256xi32>
    %312 = arith.select %308, %310, %311 : vector<8x256xi1>, vector<8x256xi32>
    %cst_40 = arith.constant dense<2147483647> : vector<8xi32>
    %313 = vector.multi_reduction <minsi>, %312, %cst_40 [1] : vector<8x256xi32> to vector<8xi32>
    %314 = vector.shape_cast %313 : vector<8xi32> to vector<8x1xi32>
    %315 = arith.addf %296, %306 : vector<8x1xf32>
    %316 = arith.cmpi eq, %314, %1 : vector<8x1xi32>
    %317 = arith.extui %316 : vector<8x1xi1> to vector<8x1xi32>
    %318 = arith.sitofp %317 : vector<8x1xi32> to vector<8x1xf32>
    %319 = arith.maximumf %300, %318 : vector<8x1xf32>
    %320 = vector.broadcast %314 : vector<8x1xi32> to vector<8x256xi32>
    %321 = arith.cmpi eq, %312, %320 : vector<8x256xi32>
    %322 = vector.broadcast %cst_8 : f32 to vector<8x256xf32>
    %323 = arith.select %321, %322, %304 : vector<8x256xi1>, vector<8x256xf32>
    %324 = arith.subf %17, %4 : vector<8x1xf32>
    %325 = arith.subf %324, %10 : vector<8x1xf32>
    %326 = arith.addf %4, %10 : vector<8x1xf32>
    %cst_41 = arith.constant 1.600000e+01 : f32
    %327 = vector.broadcast %cst_41 : f32 to vector<8x1xf32>
    %328 = arith.mulf %327, %326 : vector<8x1xf32>
    %329 = arith.subf %315, %328 : vector<8x1xf32>
    %330 = arith.mulf %319, %325 : vector<8x1xf32>
    %331 = arith.subf %329, %330 : vector<8x1xf32>
    %cst_42 = arith.constant 6.250000e-03 : f32
    %332 = vector.broadcast %cst_42 : f32 to vector<8x1xf32>
    %333 = arith.mulf %332, %331 : vector<8x1xf32>
    %cst_43 = arith.constant 0.899999976 : f32
    %334 = vector.broadcast %cst_43 : f32 to vector<8x1xf32>
    %335 = arith.mulf %334, %325 : vector<8x1xf32>
    %336 = arith.addf %333, %335 : vector<8x1xf32>
    %cst_44 = arith.constant 0.000000e+00 : f32
    %337 = vector.broadcast %cst_44 : f32 to vector<8x1xf32>
    %338 = arith.subf %337, %336 : vector<8x1xf32>
    %c0_45 = arith.constant 0 : index
    %c0_46 = arith.constant 0 : index
    %339 = vector.load %arg3[%c0_45, %c0_46] : memref<8x1xf32, #tpu.memory_space<vmem>>, vector<8x1xf32>
    tpu.vector_store %arg3[%c0_45, %c0_46], %338 {strides = array<i32>} : memref<8x1xf32, #tpu.memory_space<vmem>>, vector<8x1xf32>,
    return
  }
  func.func @transform_0(%arg0: i32) -> (i32, i32) {
    %c0_i32 = arith.constant 0 : i32
    %c0_i32_0 = arith.constant 0 : i32
    return %arg0, %c0_i32 : i32, i32
  }
  func.func @transform_1(%arg0: i32) -> (i32, i32) {
    %c0_i32 = arith.constant 0 : i32
    %c0_i32_0 = arith.constant 0 : i32
    return %arg0, %c0_i32 : i32, i32
  }
  func.func @transform_2(%arg0: i32) -> (i32, i32) {
    %c0_i32 = arith.constant 0 : i32
    %c0_i32_0 = arith.constant 0 : i32
    return %arg0, %c0_i32 : i32, i32
  }
}

</mosaic_0001>

<bundles_post_ra>
// kernel: tpu_custom_call.1
= control target key start
LH: loop header
LB: loop body
LE: loop exit
PB: predicated region body
PF: predicated region fallthrough
CT: control target
= control target key end

     0   :  { %7 = vsyncpa [#allocation3], 0  ;;  %s1257_s0 = inlined_call_operand.hbm [shape: f32[24,256], index: 0, kind: input, shape index: {}]   ;;  %s1258_s1 = inlined_call_operand.vmem [shape: s32[24,1], index: 1, kind: input, shape index: {}]   ;;  %s1259_s2 = inlined_call_operand.vmem [shape: f32[24,1], index: 2, kind: output, shape index: {}]  }
   0x1   :  { %9 = vsyncpa [#allocation3 + $0x1], 0  ;;  %s964_s9 = smov 0   ;;  %s966_s10 = smov 0  }
   0x2   :  { %s968_s11 = smov 0   ;;  %s970_s12 = smov 0  }
   0x3 LB: > { %s983_s13 = sadd.s32 4294967295, %s944_s12   ;;  %s986_s14 = sadd.s32 1, %s944_s12   ;;  %s944_s12 = sphi %s970_s12, %s1267_s12   ;;  %s940_s11 = sphi %s968_s11, %s1266_s11   ;;  %s936_s10 = sphi %s966_s10, %s1265_s10   ;;  %s932_s9 = sphi %s964_s9, %s1264_s9  }
   0x4   : > { %s19_s15 = ssub.s32 %s944_s12, %s986_s14  ;;  %s22_s16 = sadd.s32 1, %s940_s11 }
   0x5   : > { %p20_p0 = scmp.eq.s32.totalorder %s19_s15, 0  ;;  %p29_p1 = scmp.ne.s32.totalorder %s940_s11, %s936_s10 }
   0x6   : > { %p30_p2 = scmp.eq.s32.totalorder %s944_s12, 0  ;;  %p35_p3 = scmp.ne.s32.totalorder %s936_s10, %s932_s9 }
   0x7   : > { %s996_s17 = scalar_select %p20_p0, %s940_s11, %s22_s16  }
   0x8   : > { %p31_p4 = por %p30_p2, %p29_p1  ;;  %p36_p5 = scmp.eq.s32.totalorder %s983_s13, 0 }
   0x9   : > { %p837_p6 = scmp.lt.s32.totalorder %s944_s12, 3  ;;  %s111_s19 = sand.u32 1, %s940_s11  }
   0xa   : > { %p1000_p7 = por %p36_p5, %p35_p3  ;;  %s805_s20 = sshll.u32 %s111_s19, 4 }
   0xb   : > { %s830_s21 = sshll.u32 %s944_s12, 8  ;;  %s115_s25 = scalar_lea.vmem [#allocation2], %s805_s20 }
   0xc   : > { %s1009_s24 = scalar_lea.hbm %s1257_s0, %s830_s21  ;;  %s123_s26 = sshll.u32 %s115_s25, 4  ;;  %s1011_s26 = int_to_ptr.vmem [resolvable:$true] %s123_s26 }
   0xd   : > { %p1013_p8 = pnand %p837_p6, %p31_p4  ;;  %s112_s28 = scalar_lea.sflag [#allocation3], %s111_s19 }
   0xe   : > { %s880_s29 = scalar_lea.hbm %s1009_s24, 256  ;;  %s885_s4 = scalar_lea.hbm %s1257_s0, 768 }
   0xf   : > { %p881_p11 = scmp.ne.s32.totalorder %s1009_s24, %s880_s29  ;;  %p882_p12 = pneg %p1013_p8 }
  0x10   : > { %p886_p1 = scmp.lt.u32.totalorder %s1009_s24, %s1257_s0  ;;  %p887_p2 = scmp.lt.u32.totalorder %s885_s4, %s880_s29 }
  0x11   : > { %p883_p13 = pnand %p882_p12, %p881_p11  ;;  %p889_p4 = scmp.lt.u32.totalorder %s880_s29, %s1009_s24 }
  0x12   : > { %p888_p3 = por %p887_p2, %p886_p1 }
  0x13   : > { %p884_p0 = pneg %p883_p13 }
  0x14   : > { %p890_p5 = por %p889_p4, %p888_p3 }
  0x16   : > { %p891_p6 = pnand %p890_p5, %p884_p0 }
  0x18   : > { %894 = shalt.err (!%p891_p6)
}
  0x19   : > { %s895_s7 = scalar_lea.vmem %s1011_s26, 256  ;;  %s946_s8 = smov [#allocation2]  }
  0x1a   : > { %p896_p11 = scmp.ne.s32.totalorder %s1011_s26, %s895_s7  ;;  %s900_s9 = sshll.u32 %s946_s8, 4  ;;  %s901_s9 = int_to_ptr.vmem [resolvable:$false] %s900_s9 }
  0x1b   : > { %s902_s15 = scalar_lea.vmem %s901_s9, 512  ;;  %p903_p10 = scmp.lt.s32.totalorder %s1011_s26, %s901_s9 }
  0x1c   : > { %p898_p13 = pnand %p896_p11, %p882_p12  ;;  %p904_p1 = scmp.lt.s32.totalorder %s902_s15, %s895_s7 }
  0x1e   : > { %p899_p9 = pneg %p898_p13  ;;  %p905_p2 = por %p904_p1, %p903_p10 }
  0x20   : > { %p906_p3 = pnand %p905_p2, %p899_p9 }
  0x22   : > { %909 = shalt.err (!%p906_p3)
}
  0x23   : > { %836 = dma.hbm_to_vmem [thread:$0]  (!%p1013_p8), %s1009_s24, 256, %s1011_s26, %s112_s28  }
  0x24   : > { %p1262_p0 = scmp.lt.s32.totalorder %s944_s12, 4  ;;  %p1263_p4 = scmp.ge.s32.totalorder %s944_s12, 1 }
  0x26   : > { %p136_p12 = pnand %p1263_p4, %p1262_p0 }
  0x27   : > { %s141_s16 = sand.u32 (!%p136_p12), 1, %s936_s10  }
  0x28   : > { %139 = sbr.rel (%p136_p12) target bundleno = 7166 (0x1bfe), region = 28  ;;  %s809_s19 = sshll.u32 (!%p136_p12), %s141_s16, 4 }
  0x29   : > { %s142_s20 = scalar_lea.sflag (!%p136_p12), [#allocation3], %s141_s16  ;;  %s145_s21 = scalar_lea.vmem (!%p136_p12), [#allocation2], %s809_s19 }
  0x2f   : > { %927 = dma.done.wait (%p1000_p7), %s142_s20, 256  }
  0x30   : > { %929 = vsyncadd (%p1000_p7), %s142_s20, 4294967040  ;;  %v1053_v0 = vld [vmem:[%s145_s21] sm:$0xff]  ;;  %v1055_v1 = vld [vmem:[%s145_s21 + $0x8] sm:$0xff]  ;;  %v180_v3 = vlaneseq  ;;  %p169_p7 = scmp.lt.s32.totalorder %s983_s13, 2  ;;  %v947_v39 = vmov 0.0  }
  0x31   : > { %v183_v2 = vmax.f32 %v1053_v0, %v1055_v1 }
  0x32   : > { %v1059_v4 = vand.u32 127, %v180_v3  ;;  %s1269_s13 = smov (!%p169_p7, %s983_s13), 2 }
  0x33   : > { %184 = vmax.xlane.f32.xlu0 %v183_v2  ;;  %s810_s12 = sshll.u32 %s1269_s13, 3 }
  0x34   : > { %v1062_v5 = vadd.s32 128, %v1059_v4  ;;  %s172_s23 = scalar_lea.vmem %s1258_s1, %s810_s12  ;;  %s176_s26 = scalar_lea.vmem %s1259_s2, %s810_s12 }
  0x35   : > { %v1090_v34 = vld [vmem:[%s172_s23] sm:$0xff] }
  0xc0   : > { %v1064_v6 = vpop.xlane.xlu0 %184 }
  0xc1   : > { %vm207_vm0 = vcmp.eq.f32.partialorder %v1053_v0, %v1064_v6  ;;  %vm208_vm1 = vcmp.eq.f32.partialorder %v1055_v1, %v1064_v6 }
  0xc2   : > { %v209_v7 = vsel %vm207_vm0, %v1059_v4, 256  ;;  %v210_v8 = vsel %vm208_vm1, %v1062_v5, 256 }
  0xc3   : > { %vm211_vm2 = vcmp.lt.s32.totalorder %v209_v7, %v210_v8 }
  0xc4   : > { %v212_v9 = vsel %vm211_vm2, %v209_v7, %v210_v8 }
  0xc5   : > { %v214_v10 = vshra.s32 %v212_v9, 16  ;;  %v213_v12 = vand.u32 65535, %v212_v9 }
  0xc7   : > { %v216_v11 = vcvt.s32.f32 %v214_v10  ;;  %v215_v14 = vcvt.s32.f32 %v213_v12 }
  0xc9   : > { %217 = vmin.xlane.f32.xlu0 %v216_v11 }
 0x156   : > { %v218_v13 = vpop.xlane.xlu0 %217 }
 0x157   : > { %vm219_vm3 = vcmp.eq.f32.partialorder %v216_v11, %v218_v13  ;;  %v224_v16 = vcvt.f32.s32 %v218_v13 }
 0x158   : > { %v220_v15 = vsel %vm219_vm3, %v215_v14, inf }
 0x159   : > { %221 = vmin.xlane.f32.xlu1 %v220_v15  ;;  %v225_v18 = vshll.u32 %v224_v16, 16 }
 0x1e6   : > { %v222_v17 = vpop.xlane.xlu1 %221 }
 0x1e7   : > { %v223_v19 = vcvt.f32.s32 %v222_v17 }
 0x1e9   : > { %v226_v20 = vadd.s32 %v225_v18, %v223_v19 }
 0x1eb   : > { %vm232_vm4 = vcmp.eq.s32.totalorder %v209_v7, %v226_v20  ;;  %vm233_vm5 = vcmp.eq.s32.totalorder %v210_v8, %v226_v20  ;;  %vm228_vm10 = vcmp.eq.s32.totalorder %v226_v20, %v1090_v34 }
 0x1ec   : > { %v234_v21 = vsel %vm232_vm4, -inf, %v1053_v0  ;;  %v235_v22 = vsel %vm233_vm5, -inf, %v1055_v1  ;;  %v812_v40 = vsel %vm228_vm10, 1.0, %v947_v39 }
 0x1ed   : > { %v236_v23 = vmax.f32 %v234_v21, %v235_v22  ;;  %v231_v42 = vmax.f32 %v812_v40, 0.0 }
 0x1ef   : > { %237 = vmax.xlane.f32.xlu1 %v236_v23 }
 0x27c   : > { %v1074_v24 = vpop.xlane.xlu1 %237 }
 0x27d   : > { %vm239_vm6 = vcmp.eq.f32.partialorder %v234_v21, %v1074_v24  ;;  %vm240_vm7 = vcmp.eq.f32.partialorder %v235_v22, %v1074_v24 }
 0x27e   : > { %v241_v25 = vsel %vm239_vm6, %v1059_v4, 256  ;;  %v242_v26 = vsel %vm240_vm7, %v1062_v5, 256 }
 0x27f   : > { %vm243_vm8 = vcmp.lt.s32.totalorder %v241_v25, %v242_v26 }
 0x280   : > { %v244_v27 = vsel %vm243_vm8, %v241_v25, %v242_v26 }
 0x281   : > { %v246_v28 = vshra.s32 %v244_v27, 16  ;;  %v245_v30 = vand.u32 65535, %v244_v27 }
 0x283   : > { %v248_v29 = vcvt.s32.f32 %v246_v28  ;;  %v247_v32 = vcvt.s32.f32 %v245_v30 }
 0x285   : > { %249 = vmin.xlane.f32.xlu0 %v248_v29 }
 0x312   : > { %v250_v31 = vpop.xlane.xlu0 %249 }
 0x313   : > { %vm251_vm9 = vcmp.eq.f32.partialorder %v248_v29, %v250_v31  ;;  %v256_v35 = vcvt.f32.s32 %v250_v31 }
 0x314   : > { %v252_v33 = vsel %vm251_vm9, %v247_v32, inf }
 0x315   : > { %253 = vmin.xlane.f32.xlu1 %v252_v33  ;;  %v257_v37 = vshll.u32 %v256_v35, 16 }
 0x3a2   : > { %v254_v36 = vpop.xlane.xlu1 %253 }
 0x3a3   : > { %v255_v38 = vcvt.f32.s32 %v254_v36 }
 0x3a5   : > { %v258_v41 = vadd.s32 %v257_v37, %v255_v38 }
 0x3a7   : > { %vm260_vm11 = vcmp.eq.s32.totalorder %v258_v41, %v1090_v34  ;;  %vm264_vm12 = vcmp.eq.s32.totalorder %v241_v25, %v258_v41  ;;  %vm265_vm13 = vcmp.eq.s32.totalorder %v242_v26, %v258_v41 }
 0x3a8   : > { %v813_v43 = vsel %vm260_vm11, 1.0, %v947_v39  ;;  %v266_v44 = vsel %vm264_vm12, -inf, %v234_v21  ;;  %v267_v45 = vsel %vm265_vm13, -inf, %v235_v22 }
 0x3a9   : > { %v263_v46 = vmax.f32 %v231_v42, %v813_v43  ;;  %v268_v47 = vmax.f32 %v266_v44, %v267_v45 }
 0x3ab   : > { %269 = vmax.xlane.f32.xlu0 %v268_v47 }
 0x438   : > { %v1096_v48 = vpop.xlane.xlu0 %269 }
 0x439   : > { %vm271_vm14 = vcmp.eq.f32.partialorder %v266_v44, %v1096_v48  ;;  %vm272_vm15 = vcmp.eq.f32.partialorder %v267_v45, %v1096_v48 }
 0x43a   : > { %v273_v49 = vsel %vm271_vm14, %v1059_v4, 256  ;;  %v274_v50 = vsel %vm272_vm15, %v1062_v5, 256 }
 0x43b   : > { %vm275_vm0 = vcmp.lt.s32.totalorder %v273_v49, %v274_v50 }
 0x43c   : > { %v276_v51 = vsel %vm275_vm0, %v273_v49, %v274_v50 }
 0x43d   : > { %v278_v52 = vshra.s32 %v276_v51, 16  ;;  %v277_v54 = vand.u32 65535, %v276_v51 }
 0x43f   : > { %v280_v53 = vcvt.s32.f32 %v278_v52  ;;  %v279_v56 = vcvt.s32.f32 %v277_v54 }
 0x441   : > { %281 = vmin.xlane.f32.xlu1 %v280_v53 }
 0x4ce   : > { %v282_v55 = vpop.xlane.xlu1 %281 }
 0x4cf   : > { %vm283_vm1 = vcmp.eq.f32.partialorder %v280_v53, %v282_v55  ;;  %v288_v58 = vcvt.f32.s32 %v282_v55 }
 0x4d0   : > { %v284_v57 = vsel %vm283_vm1, %v279_v56, inf }
 0x4d1   : > { %285 = vmin.xlane.f32.xlu0 %v284_v57  ;;  %v289_v60 = vshll.u32 %v288_v58, 16 }
 0x55e   : > { %v286_v59 = vpop.xlane.xlu0 %285 }
 0x55f   : > { %v287_v61 = vcvt.f32.s32 %v286_v59 }
 0x561   : > { %v290_v62 = vadd.s32 %v289_v60, %v287_v61 }
 0x563   : > { %vm292_vm2 = vcmp.eq.s32.totalorder %v290_v62, %v1090_v34  ;;  %vm296_vm3 = vcmp.eq.s32.totalorder %v273_v49, %v290_v62  ;;  %vm297_vm4 = vcmp.eq.s32.totalorder %v274_v50, %v290_v62 }
 0x564   : > { %v814_v63 = vsel %vm292_vm2, 1.0, %v947_v39  ;;  %v298_v2 = vsel %vm296_vm3, -inf, %v266_v44  ;;  %v299_v3 = vsel %vm297_vm4, -inf, %v267_v45 }
 0x565   : > { %v295_v7 = vmax.f32 %v263_v46, %v814_v63  ;;  %v300_v8 = vmax.f32 %v298_v2, %v299_v3 }
 0x567   : > { %301 = vmax.xlane.f32.xlu1 %v300_v8 }
 0x5f4   : > { %v1104_v9 = vpop.xlane.xlu1 %301 }
 0x5f5   : > { %vm303_vm5 = vcmp.eq.f32.partialorder %v298_v2, %v1104_v9  ;;  %vm304_vm6 = vcmp.eq.f32.partialorder %v299_v3, %v1104_v9 }
 0x5f6   : > { %v305_v10 = vsel %vm303_vm5, %v1059_v4, 256  ;;  %v306_v11 = vsel %vm304_vm6, %v1062_v5, 256 }
 0x5f7   : > { %vm307_vm7 = vcmp.lt.s32.totalorder %v305_v10, %v306_v11 }
 0x5f8   : > { %v308_v12 = vsel %vm307_vm7, %v305_v10, %v306_v11 }
 0x5f9   : > { %v310_v13 = vshra.s32 %v308_v12, 16  ;;  %v309_v15 = vand.u32 65535, %v308_v12 }
 0x5fb   : > { %v312_v14 = vcvt.s32.f32 %v310_v13  ;;  %v311_v17 = vcvt.s32.f32 %v309_v15 }
 0x5fd   : > { %313 = vmin.xlane.f32.xlu0 %v312_v14 }
 0x68a   : > { %v314_v16 = vpop.xlane.xlu0 %313 }
 0x68b   : > { %vm315_vm8 = vcmp.eq.f32.partialorder %v312_v14, %v314_v16  ;;  %v320_v19 = vcvt.f32.s32 %v314_v16 }
 0x68c   : > { %v316_v18 = vsel %vm315_vm8, %v311_v17, inf }
 0x68d   : > { %317 = vmin.xlane.f32.xlu1 %v316_v18  ;;  %v321_v21 = vshll.u32 %v320_v19, 16 }
 0x71a   : > { %v318_v20 = vpop.xlane.xlu1 %317 }
 0x71b   : > { %v319_v22 = vcvt.f32.s32 %v318_v20 }
 0x71d   : > { %v322_v23 = vadd.s32 %v321_v21, %v319_v22 }
 0x71f   : > { %vm324_vm9 = vcmp.eq.s32.totalorder %v322_v23, %v1090_v34  ;;  %vm328_vm10 = vcmp.eq.s32.totalorder %v305_v10, %v322_v23  ;;  %vm329_vm11 = vcmp.eq.s32.totalorder %v306_v11, %v322_v23 }
 0x720   : > { %v815_v25 = vsel %vm324_vm9, 1.0, %v947_v39  ;;  %v330_v26 = vsel %vm328_vm10, -inf, %v298_v2  ;;  %v331_v27 = vsel %vm329_vm11, -inf, %v299_v3 }
 0x721   : > { %v327_v28 = vmax.f32 %v295_v7, %v815_v25  ;;  %v332_v29 = vmax.f32 %v330_v26, %v331_v27 }
 0x723   : > { %333 = vmax.xlane.f32.xlu0 %v332_v29 }
 0x7b0   : > { %v1112_v30 = vpop.xlane.xlu0 %333 }
 0x7b1   : > { %vm335_vm12 = vcmp.eq.f32.partialorder %v330_v26, %v1112_v30  ;;  %vm336_vm13 = vcmp.eq.f32.partialorder %v331_v27, %v1112_v30 }
 0x7b2   : > { %v337_v31 = vsel %vm335_vm12, %v1059_v4, 256  ;;  %v338_v32 = vsel %vm336_vm13, %v1062_v5, 256 }
 0x7b3   : > { %vm339_vm14 = vcmp.lt.s32.totalorder %v337_v31, %v338_v32 }
 0x7b4   : > { %v340_v33 = vsel %vm339_vm14, %v337_v31, %v338_v32 }
 0x7b5   : > { %v342_v35 = vshra.s32 %v340_v33, 16  ;;  %v341_v37 = vand.u32 65535, %v340_v33 }
 0x7b7   : > { %v344_v36 = vcvt.s32.f32 %v342_v35  ;;  %v343_v40 = vcvt.s32.f32 %v341_v37 }
 0x7b9   : > { %345 = vmin.xlane.f32.xlu1 %v344_v36 }
 0x846   : > { %v346_v38 = vpop.xlane.xlu1 %345 }
 0x847   : > { %vm347_vm15 = vcmp.eq.f32.partialorder %v344_v36, %v346_v38  ;;  %v352_v42 = vcvt.f32.s32 %v346_v38 }
 0x848   : > { %v348_v41 = vsel %vm347_vm15, %v343_v40, inf }
 0x849   : > { %349 = vmin.xlane.f32.xlu0 %v348_v41  ;;  %v353_v44 = vshll.u32 %v352_v42, 16 }
 0x8d6   : > { %v350_v43 = vpop.xlane.xlu0 %349 }
 0x8d7   : > { %v351_v45 = vcvt.f32.s32 %v350_v43 }
 0x8d9   : > { %v354_v46 = vadd.s32 %v353_v44, %v351_v45 }
 0x8db   : > { %vm356_vm0 = vcmp.eq.s32.totalorder %v354_v46, %v1090_v34  ;;  %vm360_vm1 = vcmp.eq.s32.totalorder %v337_v31, %v354_v46  ;;  %vm361_vm2 = vcmp.eq.s32.totalorder %v338_v32, %v354_v46 }
 0x8dc   : > { %v816_v47 = vsel %vm356_vm0, 1.0, %v947_v39  ;;  %v362_v49 = vsel %vm360_vm1, -inf, %v330_v26  ;;  %v363_v50 = vsel %vm361_vm2, -inf, %v331_v27 }
 0x8dd   : > { %v359_v51 = vmax.f32 %v327_v28, %v816_v47  ;;  %v364_v52 = vmax.f32 %v362_v49, %v363_v50 }
 0x8df   : > { %365 = vmax.xlane.f32.xlu1 %v364_v52 }
 0x96c   : > { %v1120_v53 = vpop.xlane.xlu1 %365 }
 0x96d   : > { %vm367_vm3 = vcmp.eq.f32.partialorder %v362_v49, %v1120_v53  ;;  %vm368_vm4 = vcmp.eq.f32.partialorder %v363_v50, %v1120_v53 }
 0x96e   : > { %v369_v54 = vsel %vm367_vm3, %v1059_v4, 256  ;;  %v370_v55 = vsel %vm368_vm4, %v1062_v5, 256 }
 0x96f   : > { %vm371_vm5 = vcmp.lt.s32.totalorder %v369_v54, %v370_v55 }
 0x970   : > { %v372_v56 = vsel %vm371_vm5, %v369_v54, %v370_v55 }
 0x971   : > { %v374_v57 = vshra.s32 %v372_v56, 16  ;;  %v373_v59 = vand.u32 65535, %v372_v56 }
 0x973   : > { %v376_v58 = vcvt.s32.f32 %v374_v57  ;;  %v375_v61 = vcvt.s32.f32 %v373_v59 }
 0x975   : > { %377 = vmin.xlane.f32.xlu0 %v376_v58 }
 0xa02   : > { %v378_v60 = vpop.xlane.xlu0 %377 }
 0xa03   : > { %vm379_vm6 = vcmp.eq.f32.partialorder %v376_v58, %v378_v60  ;;  %v384_v63 = vcvt.f32.s32 %v378_v60 }
 0xa04   : > { %v380_v62 = vsel %vm379_vm6, %v375_v61, inf }
 0xa05   : > { %381 = vmin.xlane.f32.xlu1 %v380_v62  ;;  %v385_v3 = vshll.u32 %v384_v63, 16 }
 0xa92   : > { %v382_v2 = vpop.xlane.xlu1 %381 }
 0xa93   : > { %v383_v7 = vcvt.f32.s32 %v382_v2 }
 0xa95   : > { %v386_v8 = vadd.s32 %v385_v3, %v383_v7 }
 0xa97   : > { %vm388_vm7 = vcmp.eq.s32.totalorder %v386_v8, %v1090_v34  ;;  %vm392_vm8 = vcmp.eq.s32.totalorder %v369_v54, %v386_v8  ;;  %vm393_vm9 = vcmp.eq.s32.totalorder %v370_v55, %v386_v8 }
 0xa98   : > { %v817_v10 = vsel %vm388_vm7, 1.0, %v947_v39  ;;  %v394_v11 = vsel %vm392_vm8, -inf, %v362_v49  ;;  %v395_v12 = vsel %vm393_vm9, -inf, %v363_v50 }
 0xa99   : > { %v391_v13 = vmax.f32 %v359_v51, %v817_v10  ;;  %v396_v14 = vmax.f32 %v394_v11, %v395_v12 }
 0xa9b   : > { %397 = vmax.xlane.f32.xlu0 %v396_v14 }
 0xb28   : > { %v1128_v15 = vpop.xlane.xlu0 %397 }
 0xb29   : > { %vm399_vm10 = vcmp.eq.f32.partialorder %v394_v11, %v1128_v15  ;;  %vm400_vm11 = vcmp.eq.f32.partialorder %v395_v12, %v1128_v15 }
 0xb2a   : > { %v401_v16 = vsel %vm399_vm10, %v1059_v4, 256  ;;  %v402_v17 = vsel %vm400_vm11, %v1062_v5, 256 }
 0xb2b   : > { %vm403_vm12 = vcmp.lt.s32.totalorder %v401_v16, %v402_v17 }
 0xb2c   : > { %v404_v18 = vsel %vm403_vm12, %v401_v16, %v402_v17 }
 0xb2d   : > { %v406_v19 = vshra.s32 %v404_v18, 16  ;;  %v405_v21 = vand.u32 65535, %v404_v18 }
 0xb2f   : > { %v408_v20 = vcvt.s32.f32 %v406_v19  ;;  %v407_v23 = vcvt.s32.f32 %v405_v21 }
 0xb31   : > { %409 = vmin.xlane.f32.xlu1 %v408_v20 }
 0xbbe   : > { %v410_v22 = vpop.xlane.xlu1 %409 }
 0xbbf   : > { %vm411_vm13 = vcmp.eq.f32.partialorder %v408_v20, %v410_v22  ;;  %v416_v26 = vcvt.f32.s32 %v410_v22 }
 0xbc0   : > { %v412_v25 = vsel %vm411_vm13, %v407_v23, inf }
 0xbc1   : > { %413 = vmin.xlane.f32.xlu0 %v412_v25  ;;  %v417_v28 = vshll.u32 %v416_v26, 16 }
 0xc4e   : > { %v414_v27 = vpop.xlane.xlu0 %413 }
 0xc4f   : > { %v415_v29 = vcvt.f32.s32 %v414_v27 }
 0xc51   : > { %v418_v31 = vadd.s32 %v417_v28, %v415_v29 }
 0xc53   : > { %vm420_vm14 = vcmp.eq.s32.totalorder %v418_v31, %v1090_v34  ;;  %vm424_vm15 = vcmp.eq.s32.totalorder %v401_v16, %v418_v31  ;;  %vm425_vm0 = vcmp.eq.s32.totalorder %v402_v17, %v418_v31 }
 0xc54   : > { %v818_v32 = vsel %vm420_vm14, 1.0, %v947_v39  ;;  %v426_v33 = vsel %vm424_vm15, -inf, %v394_v11  ;;  %v427_v35 = vsel %vm425_vm0, -inf, %v395_v12 }
 0xc55   : > { %v423_v36 = vmax.f32 %v391_v13, %v818_v32  ;;  %v428_v37 = vmax.f32 %v426_v33, %v427_v35 }
 0xc57   : > { %429 = vmax.xlane.f32.xlu1 %v428_v37 }
 0xce4   : > { %v1136_v38 = vpop.xlane.xlu1 %429 }
 0xce5   : > { %vm431_vm1 = vcmp.eq.f32.partialorder %v426_v33, %v1136_v38  ;;  %vm432_vm2 = vcmp.eq.f32.partialorder %v427_v35, %v1136_v38 }
 0xce6   : > { %v433_v40 = vsel %vm431_vm1, %v1059_v4, 256  ;;  %v434_v41 = vsel %vm432_vm2, %v1062_v5, 256 }
 0xce7   : > { %vm435_vm3 = vcmp.lt.s32.totalorder %v433_v40, %v434_v41 }
 0xce8   : > { %v436_v42 = vsel %vm435_vm3, %v433_v40, %v434_v41 }
 0xce9   : > { %v438_v43 = vshra.s32 %v436_v42, 16  ;;  %v437_v45 = vand.u32 65535, %v436_v42 }
 0xceb   : > { %v440_v44 = vcvt.s32.f32 %v438_v43  ;;  %v439_v47 = vcvt.s32.f32 %v437_v45 }
 0xced   : > { %441 = vmin.xlane.f32.xlu0 %v440_v44 }
 0xd7a   : > { %v442_v46 = vpop.xlane.xlu0 %441 }
 0xd7b   : > { %vm443_vm4 = vcmp.eq.f32.partialorder %v440_v44, %v442_v46  ;;  %v448_v50 = vcvt.f32.s32 %v442_v46 }
 0xd7c   : > { %v444_v49 = vsel %vm443_vm4, %v439_v47, inf }
 0xd7d   : > { %445 = vmin.xlane.f32.xlu1 %v444_v49  ;;  %v449_v52 = vshll.u32 %v448_v50, 16 }
 0xe0a   : > { %v446_v51 = vpop.xlane.xlu1 %445 }
 0xe0b   : > { %v447_v54 = vcvt.f32.s32 %v446_v51 }
 0xe0d   : > { %v450_v55 = vadd.s32 %v449_v52, %v447_v54 }
 0xe0f   : > { %vm452_vm5 = vcmp.eq.s32.totalorder %v450_v55, %v1090_v34  ;;  %vm456_vm6 = vcmp.eq.s32.totalorder %v433_v40, %v450_v55  ;;  %vm457_vm7 = vcmp.eq.s32.totalorder %v434_v41, %v450_v55 }
 0xe10   : > { %v819_v56 = vsel %vm452_vm5, 1.0, %v947_v39  ;;  %v458_v57 = vsel %vm456_vm6, -inf, %v426_v33  ;;  %v459_v58 = vsel %vm457_vm7, -inf, %v427_v35 }
 0xe11   : > { %v455_v59 = vmax.f32 %v423_v36, %v819_v56  ;;  %v460_v60 = vmax.f32 %v458_v57, %v459_v58 }
 0xe13   : > { %461 = vmax.xlane.f32.xlu0 %v460_v60 }
 0xea0   : > { %v1144_v61 = vpop.xlane.xlu0 %461 }
 0xea1   : > { %vm463_vm8 = vcmp.eq.f32.partialorder %v458_v57, %v1144_v61  ;;  %vm464_vm9 = vcmp.eq.f32.partialorder %v459_v58, %v1144_v61 }
 0xea2   : > { %v465_v62 = vsel %vm463_vm8, %v1059_v4, 256  ;;  %v466_v63 = vsel %vm464_vm9, %v1062_v5, 256 }
 0xea3   : > { %vm467_vm10 = vcmp.lt.s32.totalorder %v465_v62, %v466_v63 }
 0xea4   : > { %v468_v2 = vsel %vm467_vm10, %v465_v62, %v466_v63 }
 0xea5   : > { %v470_v3 = vshra.s32 %v468_v2, 16  ;;  %v469_v8 = vand.u32 65535, %v468_v2 }
 0xea7   : > { %v472_v7 = vcvt.s32.f32 %v470_v3  ;;  %v471_v11 = vcvt.s32.f32 %v469_v8 }
 0xea9   : > { %473 = vmin.xlane.f32.xlu1 %v472_v7 }
 0xf36   : > { %v474_v10 = vpop.xlane.xlu1 %473 }
 0xf37   : > { %vm475_vm11 = vcmp.eq.f32.partialorder %v472_v7, %v474_v10  ;;  %v480_v13 = vcvt.f32.s32 %v474_v10 }
 0xf38   : > { %v476_v12 = vsel %vm475_vm11, %v471_v11, inf }
 0xf39   : > { %477 = vmin.xlane.f32.xlu0 %v476_v12  ;;  %v481_v16 = vshll.u32 %v480_v13, 16 }
 0xfc6   : > { %v478_v14 = vpop.xlane.xlu0 %477 }
 0xfc7   : > { %v479_v17 = vcvt.f32.s32 %v478_v14 }
 0xfc9   : > { %v482_v18 = vadd.s32 %v481_v16, %v479_v17 }
 0xfcb   : > { %vm484_vm12 = vcmp.eq.s32.totalorder %v482_v18, %v1090_v34  ;;  %vm488_vm13 = vcmp.eq.s32.totalorder %v465_v62, %v482_v18  ;;  %vm489_vm14 = vcmp.eq.s32.totalorder %v466_v63, %v482_v18 }
 0xfcc   : > { %v820_v19 = vsel %vm484_vm12, 1.0, %v947_v39  ;;  %v490_v20 = vsel %vm488_vm13, -inf, %v458_v57  ;;  %v491_v21 = vsel %vm489_vm14, -inf, %v459_v58 }
 0xfcd   : > { %v487_v22 = vmax.f32 %v455_v59, %v820_v19  ;;  %v492_v23 = vmax.f32 %v490_v20, %v491_v21 }
 0xfcf   : > { %493 = vmax.xlane.f32.xlu1 %v492_v23 }
0x105c   : > { %v1152_v25 = vpop.xlane.xlu1 %493 }
0x105d   : > { %vm495_vm15 = vcmp.eq.f32.partialorder %v490_v20, %v1152_v25  ;;  %vm496_vm0 = vcmp.eq.f32.partialorder %v491_v21, %v1152_v25 }
0x105e   : > { %v497_v26 = vsel %vm495_vm15, %v1059_v4, 256  ;;  %v498_v27 = vsel %vm496_vm0, %v1062_v5, 256 }
0x105f   : > { %vm499_vm1 = vcmp.lt.s32.totalorder %v497_v26, %v498_v27 }
0x1060   : > { %v500_v28 = vsel %vm499_vm1, %v497_v26, %v498_v27 }
0x1061   : > { %v502_v29 = vshra.s32 %v500_v28, 16  ;;  %v501_v32 = vand.u32 65535, %v500_v28 }
0x1063   : > { %v504_v31 = vcvt.s32.f32 %v502_v29  ;;  %v503_v35 = vcvt.s32.f32 %v501_v32 }
0x1065   : > { %505 = vmin.xlane.f32.xlu0 %v504_v31 }
0x10f2   : > { %v506_v33 = vpop.xlane.xlu0 %505 }
0x10f3   : > { %vm507_vm2 = vcmp.eq.f32.partialorder %v504_v31, %v506_v33  ;;  %v512_v37 = vcvt.f32.s32 %v506_v33 }
0x10f4   : > { %v508_v36 = vsel %vm507_vm2, %v503_v35, inf }
0x10f5   : > { %509 = vmin.xlane.f32.xlu1 %v508_v36  ;;  %v513_v41 = vshll.u32 %v512_v37, 16 }
0x1182   : > { %v510_v40 = vpop.xlane.xlu1 %509 }
0x1183   : > { %v511_v42 = vcvt.f32.s32 %v510_v40 }
0x1185   : > { %v514_v43 = vadd.s32 %v513_v41, %v511_v42 }
0x1187   : > { %vm516_vm3 = vcmp.eq.s32.totalorder %v514_v43, %v1090_v34  ;;  %vm520_vm4 = vcmp.eq.s32.totalorder %v497_v26, %v514_v43  ;;  %vm521_vm5 = vcmp.eq.s32.totalorder %v498_v27, %v514_v43 }
0x1188   : > { %v821_v44 = vsel %vm516_vm3, 1.0, %v947_v39  ;;  %v522_v45 = vsel %vm520_vm4, -inf, %v490_v20  ;;  %v523_v46 = vsel %vm521_vm5, -inf, %v491_v21 }
0x1189   : > { %v519_v47 = vmax.f32 %v487_v22, %v821_v44  ;;  %v524_v49 = vmax.f32 %v522_v45, %v523_v46 }
0x118b   : > { %525 = vmax.xlane.f32.xlu0 %v524_v49 }
0x1218   : > { %v1160_v50 = vpop.xlane.xlu0 %525 }
0x1219   : > { %vm527_vm6 = vcmp.eq.f32.partialorder %v522_v45, %v1160_v50  ;;  %vm528_vm7 = vcmp.eq.f32.partialorder %v523_v46, %v1160_v50 }
0x121a   : > { %v529_v51 = vsel %vm527_vm6, %v1059_v4, 256  ;;  %v530_v52 = vsel %vm528_vm7, %v1062_v5, 256 }
0x121b   : > { %vm531_vm8 = vcmp.lt.s32.totalorder %v529_v51, %v530_v52 }
0x121c   : > { %v532_v54 = vsel %vm531_vm8, %v529_v51, %v530_v52 }
0x121d   : > { %v534_v55 = vshra.s32 %v532_v54, 16  ;;  %v533_v57 = vand.u32 65535, %v532_v54 }
0x121f   : > { %v536_v56 = vcvt.s32.f32 %v534_v55  ;;  %v535_v59 = vcvt.s32.f32 %v533_v57 }
0x1221   : > { %537 = vmin.xlane.f32.xlu1 %v536_v56 }
0x12ae   : > { %v538_v58 = vpop.xlane.xlu1 %537 }
0x12af   : > { %vm539_vm9 = vcmp.eq.f32.partialorder %v536_v56, %v538_v58  ;;  %v544_v62 = vcvt.f32.s32 %v538_v58 }
0x12b0   : > { %v540_v60 = vsel %vm539_vm9, %v535_v59, inf }
0x12b1   : > { %541 = vmin.xlane.f32.xlu0 %v540_v60  ;;  %v545_v2 = vshll.u32 %v544_v62, 16 }
0x133e   : > { %v542_v63 = vpop.xlane.xlu0 %541 }
0x133f   : > { %v543_v3 = vcvt.f32.s32 %v542_v63 }
0x1341   : > { %v546_v7 = vadd.s32 %v545_v2, %v543_v3 }
0x1343   : > { %vm548_vm10 = vcmp.eq.s32.totalorder %v546_v7, %v1090_v34  ;;  %vm552_vm11 = vcmp.eq.s32.totalorder %v529_v51, %v546_v7  ;;  %vm553_vm12 = vcmp.eq.s32.totalorder %v530_v52, %v546_v7 }
0x1344   : > { %v822_v8 = vsel %vm548_vm10, 1.0, %v947_v39  ;;  %v554_v10 = vsel %vm552_vm11, -inf, %v522_v45  ;;  %v555_v11 = vsel %vm553_vm12, -inf, %v523_v46 }
0x1345   : > { %v551_v12 = vmax.f32 %v519_v47, %v822_v8  ;;  %v556_v13 = vmax.f32 %v554_v10, %v555_v11 }
0x1347   : > { %557 = vmax.xlane.f32.xlu1 %v556_v13 }
0x13d4   : > { %v1168_v14 = vpop.xlane.xlu1 %557 }
0x13d5   : > { %vm559_vm13 = vcmp.eq.f32.partialorder %v554_v10, %v1168_v14  ;;  %vm560_vm14 = vcmp.eq.f32.partialorder %v555_v11, %v1168_v14 }
0x13d6   : > { %v561_v16 = vsel %vm559_vm13, %v1059_v4, 256  ;;  %v562_v17 = vsel %vm560_vm14, %v1062_v5, 256 }
0x13d7   : > { %vm563_vm15 = vcmp.lt.s32.totalorder %v561_v16, %v562_v17 }
0x13d8   : > { %v564_v18 = vsel %vm563_vm15, %v561_v16, %v562_v17 }
0x13d9   : > { %v566_v19 = vshra.s32 %v564_v18, 16  ;;  %v565_v21 = vand.u32 65535, %v564_v18 }
0x13db   : > { %v568_v20 = vcvt.s32.f32 %v566_v19  ;;  %v567_v23 = vcvt.s32.f32 %v565_v21 }
0x13dd   : > { %569 = vmin.xlane.f32.xlu0 %v568_v20 }
0x146a   : > { %v570_v22 = vpop.xlane.xlu0 %569 }
0x146b   : > { %vm571_vm0 = vcmp.eq.f32.partialorder %v568_v20, %v570_v22  ;;  %v576_v27 = vcvt.f32.s32 %v570_v22 }
0x146c   : > { %v572_v26 = vsel %vm571_vm0, %v567_v23, inf }
0x146d   : > { %573 = vmin.xlane.f32.xlu1 %v572_v26  ;;  %v577_v29 = vshll.u32 %v576_v27, 16 }
0x14fa   : > { %v574_v28 = vpop.xlane.xlu1 %573 }
0x14fb   : > { %v575_v31 = vcvt.f32.s32 %v574_v28 }
0x14fd   : > { %v578_v32 = vadd.s32 %v577_v29, %v575_v31 }
0x14ff   : > { %vm580_vm1 = vcmp.eq.s32.totalorder %v578_v32, %v1090_v34  ;;  %vm584_vm2 = vcmp.eq.s32.totalorder %v561_v16, %v578_v32  ;;  %vm585_vm3 = vcmp.eq.s32.totalorder %v562_v17, %v578_v32 }
0x1500   : > { %v823_v33 = vsel %vm580_vm1, 1.0, %v947_v39  ;;  %v586_v35 = vsel %vm584_vm2, -inf, %v554_v10  ;;  %v587_v36 = vsel %vm585_vm3, -inf, %v555_v11 }
0x1501   : > { %v583_v37 = vmax.f32 %v551_v12, %v823_v33  ;;  %v588_v40 = vmax.f32 %v586_v35, %v587_v36 }
0x1503   : > { %589 = vmax.xlane.f32.xlu0 %v588_v40 }
0x1590   : > { %v1176_v41 = vpop.xlane.xlu0 %589 }
0x1591   : > { %vm591_vm4 = vcmp.eq.f32.partialorder %v586_v35, %v1176_v41  ;;  %vm592_vm5 = vcmp.eq.f32.partialorder %v587_v36, %v1176_v41 }
0x1592   : > { %v593_v42 = vsel %vm591_vm4, %v1059_v4, 256  ;;  %v594_v43 = vsel %vm592_vm5, %v1062_v5, 256 }
0x1593   : > { %vm595_vm6 = vcmp.lt.s32.totalorder %v593_v42, %v594_v43 }
0x1594   : > { %v596_v44 = vsel %vm595_vm6, %v593_v42, %v594_v43 }
0x1595   : > { %v598_v45 = vshra.s32 %v596_v44, 16  ;;  %v597_v47 = vand.u32 65535, %v596_v44 }
0x1597   : > { %v600_v46 = vcvt.s32.f32 %v598_v45  ;;  %v599_v51 = vcvt.s32.f32 %v597_v47 }
0x1599   : > { %601 = vmin.xlane.f32.xlu1 %v600_v46 }
0x1626   : > { %v602_v49 = vpop.xlane.xlu1 %601 }
0x1627   : > { %vm603_vm7 = vcmp.eq.f32.partialorder %v600_v46, %v602_v49  ;;  %v608_v54 = vcvt.f32.s32 %v602_v49 }
0x1628   : > { %v604_v52 = vsel %vm603_vm7, %v599_v51, inf }
0x1629   : > { %605 = vmin.xlane.f32.xlu0 %v604_v52  ;;  %v609_v56 = vshll.u32 %v608_v54, 16 }
0x16b6   : > { %v606_v55 = vpop.xlane.xlu0 %605 }
0x16b7   : > { %v607_v57 = vcvt.f32.s32 %v606_v55 }
0x16b9   : > { %v610_v58 = vadd.s32 %v609_v56, %v607_v57 }
0x16bb   : > { %vm612_vm8 = vcmp.eq.s32.totalorder %v610_v58, %v1090_v34  ;;  %vm616_vm9 = vcmp.eq.s32.totalorder %v593_v42, %v610_v58  ;;  %vm617_vm10 = vcmp.eq.s32.totalorder %v594_v43, %v610_v58 }
0x16bc   : > { %v824_v59 = vsel %vm612_vm8, 1.0, %v947_v39  ;;  %v618_v60 = vsel %vm616_vm9, -inf, %v586_v35  ;;  %v619_v62 = vsel %vm617_vm10, -inf, %v587_v36 }
0x16bd   : > { %v615_v63 = vmax.f32 %v583_v37, %v824_v59  ;;  %v620_v2 = vmax.f32 %v618_v60, %v619_v62  ;;  %v948_v59 = vmov 0  }
0x16be   : > { %872 = vset.pattern.permute.xlu1 %v948_v59  ;;  %873 = vset.pattern.permute.xlu0 %v948_v59 }
0x16bf   : > { %621 = vmax.xlane.f32.xlu1 %v620_v2 }
0x174c   : > { %v1184_v3 = vpop.xlane.xlu1 %621 }
0x174d   : > { %vm623_vm11 = vcmp.eq.f32.partialorder %v618_v60, %v1184_v3  ;;  %vm624_vm12 = vcmp.eq.f32.partialorder %v619_v62, %v1184_v3 }
0x174e   : > { %v625_v7 = vsel %vm623_vm11, %v1059_v4, 256  ;;  %v626_v8 = vsel %vm624_vm12, %v1062_v5, 256 }
0x174f   : > { %vm627_vm13 = vcmp.lt.s32.totalorder %v625_v7, %v626_v8 }
0x1750   : > { %v628_v10 = vsel %vm627_vm13, %v625_v7, %v626_v8 }
0x1751   : > { %v630_v11 = vshra.s32 %v628_v10, 16  ;;  %v629_v13 = vand.u32 65535, %v628_v10 }
0x1753   : > { %v632_v12 = vcvt.s32.f32 %v630_v11  ;;  %v631_v17 = vcvt.s32.f32 %v629_v13 }
0x1755   : > { %633 = vmin.xlane.f32.xlu0 %v632_v12 }
0x17e2   : > { %v634_v16 = vpop.xlane.xlu0 %633 }
0x17e3   : > { %vm635_vm14 = vcmp.eq.f32.partialorder %v632_v12, %v634_v16  ;;  %v640_v19 = vcvt.f32.s32 %v634_v16 }
0x17e4   : > { %v636_v18 = vsel %vm635_vm14, %v631_v17, inf }
0x17e5   : > { %637 = vmin.xlane.f32.xlu1 %v636_v18  ;;  %v641_v21 = vshll.u32 %v640_v19, 16 }
0x1872   : > { %v638_v20 = vpop.xlane.xlu1 %637 }
0x1873   : > { %v639_v22 = vcvt.f32.s32 %v638_v20 }
0x1875   : > { %v642_v23 = vadd.s32 %v641_v21, %v639_v22 }
0x1877   : > { %vm644_vm15 = vcmp.eq.s32.totalorder %v642_v23, %v1090_v34  ;;  %vm648_vm0 = vcmp.eq.s32.totalorder %v625_v7, %v642_v23  ;;  %vm649_vm1 = vcmp.eq.s32.totalorder %v626_v8, %v642_v23 }
0x1878   : > { %v825_v26 = vsel %vm644_vm15, 1.0, %v947_v39  ;;  %v650_v27 = vsel %vm648_vm0, -inf, %v618_v60  ;;  %v651_v28 = vsel %vm649_vm1, -inf, %v619_v62  ;;  %v186_v60 = vsub.f32 %v1053_v0, %v1064_v6 }
0x1879   : > { %v1192_v29 = vmax.f32 %v615_v63, %v825_v26  ;;  %v652_v31 = vmax.f32 %v650_v27, %v651_v28  ;;  %v187_v62 = vsub.f32 %v1055_v1, %v1064_v6  ;;  %vm723_vm0 = vcmask 7168  }
0x187a   : > { %v188_v63 = vmul.f32 1.442695, %v186_v60 }
0x187b   : > { %653 = vmax.xlane.f32.xlu0 %v652_v31  ;;  %v190_v2 = vmul.f32 1.442695, %v187_v62  ;;  %v259_v31 = vadd.f32 %v1074_v24, %v1064_v6 }
0x187c   : > { %874 = vpow2.f32 %v188_v63 }
0x187d   : > { %876 = vpow2.f32 %v190_v2 }
0x1886   : > { %v875_v13 = vpop.eup %874 }
0x1887   : > { %v877_v17 = vpop.eup %876 }
0x1888   : > { %v192_v18 = vadd.f32 %v877_v17, %v875_v13 }
0x1908   : > { %v1194_v32 = vpop.xlane.xlu0 %653 }
0x1909   : > { %vm655_vm2 = vcmp.eq.f32.partialorder %v650_v27, %v1194_v32  ;;  %vm656_vm3 = vcmp.eq.f32.partialorder %v651_v28, %v1194_v32 }
0x190a   : > { %v657_v33 = vsel %vm655_vm2, %v1059_v4, 256  ;;  %v658_v35 = vsel %vm656_vm3, %v1062_v5, 256 }
0x190b   : > { %vm659_vm4 = vcmp.lt.s32.totalorder %v657_v33, %v658_v35 }
0x190c   : > { %v660_v36 = vsel %vm659_vm4, %v657_v33, %v658_v35 }
0x190d   : > { %v662_v37 = vshra.s32 %v660_v36, 16  ;;  %v661_v42 = vand.u32 65535, %v660_v36 }
0x190f   : > { %v664_v40 = vcvt.s32.f32 %v662_v37  ;;  %v663_v44 = vcvt.s32.f32 %v661_v42 }
0x1911   : > { %665 = vmin.xlane.f32.xlu1 %v664_v40 }
0x199e   : > { %v666_v43 = vpop.xlane.xlu1 %665 }
0x199f   : > { %vm667_vm5 = vcmp.eq.f32.partialorder %v664_v40, %v666_v43  ;;  %v672_v46 = vcvt.f32.s32 %v666_v43 }
0x19a0   : > { %v668_v45 = vsel %vm667_vm5, %v663_v44, inf }
0x19a1   : > { %669 = vmin.xlane.f32.xlu0 %v668_v45  ;;  %v673_v49 = vshll.u32 %v672_v46, 16 }
0x1a2e   : > { %v670_v47 = vpop.xlane.xlu0 %669 }
0x1a2f   : > { %v671_v51 = vcvt.f32.s32 %v670_v47 }
0x1a31   : > { %v674_v52 = vadd.s32 %v673_v49, %v671_v51 }
0x1a33   : > { %vm676_vm6 = vcmp.eq.s32.totalorder %v674_v52, %v1090_v34  ;;  %vm680_vm7 = vcmp.eq.s32.totalorder %v657_v33, %v674_v52  ;;  %vm681_vm8 = vcmp.eq.s32.totalorder %v658_v35, %v674_v52  ;;  %v291_v33 = vadd.f32 %v1096_v48, %v259_v31 }
0x1a34   : > { %v1202_v54 = vsel %vm676_vm6, 1.0, %v947_v39  ;;  %v682_v55 = vsel %vm680_vm7, -inf, %v650_v27  ;;  %v683_v56 = vsel %vm681_vm8, -inf, %v651_v28 }
0x1a35   : > { %v684_v57 = vmax.f32 %v682_v55, %v683_v56  ;;  %v679_v58 = vmax.f32 %v1192_v29, %v1202_v54 }
0x1a37   : > { %685 = vmax.xlane.f32.xlu1 %v684_v57 }
0x1a48   : > { %198 = vperm.xlu1 %872, %v1090_v34  }
0x1ac4   : > { %v686_v7 = vpop.xlane.xlu1 %685 }
0x1ac5   : > { %vm687_vm9 = vcmp.eq.f32.partialorder %v682_v55, %v686_v7  ;;  %vm688_vm10 = vcmp.eq.f32.partialorder %v683_v56, %v686_v7 }
0x1ac6   : > { %v689_v8 = vsel %vm687_vm9, %v1059_v4, 256  ;;  %v690_v10 = vsel %vm688_vm10, %v1062_v5, 256 }
0x1ac7   : > { %vm691_vm11 = vcmp.lt.s32.totalorder %v689_v8, %v690_v10 }
0x1ac8   : > { %v692_v11 = vsel %vm691_vm11, %v689_v8, %v690_v10  ;;  %v199_v19 = vpop.permute.xlu1 %198 }
0x1ac9   : > { %v694_v12 = vshra.s32 %v692_v11, 16  ;;  %v693_v20 = vand.u32 65535, %v692_v11  ;;  %vm200_vm12 = vcmp.eq.s32.totalorder %v1059_v4, %v199_v19  ;;  %vm201_vm13 = vcmp.eq.s32.totalorder %v1062_v5, %v199_v19 }
0x1aca   : > { %v202_v22 = vsel %vm200_vm12, %v1053_v0, 0.0  ;;  %v203_v23 = vsel %vm201_vm13, %v1055_v1, 0.0  ;;  %v323_v4 = vadd.f32 %v1104_v9, %v291_v33 }
0x1acb   : > { %v696_v16 = vcvt.s32.f32 %v694_v12  ;;  %v695_v26 = vcvt.s32.f32 %v693_v20  ;;  %v204_v28 = vadd.f32 %v203_v23, %v202_v22 }
0x1acc   : > { %v355_v5 = vadd.f32 %v1112_v30, %v323_v4 }
0x1acd   : > { %697 = vmin.xlane.f32.xlu0 %v696_v16 }
0x1ace   : > { %v387_v0 = vadd.f32 %v1120_v53, %v355_v5 }
0x1ad0   : > { %v419_v1 = vadd.f32 %v1128_v15, %v387_v0 }
0x1ad1   : > { %193 = vadd.xlane.f32.xlu0 %v192_v18 }
0x1ad2   : > { %v451_v36 = vadd.f32 %v1136_v38, %v419_v1 }
0x1ad4   : > { %v483_v37 = vadd.f32 %v1144_v61, %v451_v36 }
0x1ad6   : > { %v515_v42 = vadd.f32 %v1152_v25, %v483_v37 }
0x1ad8   : > { %v547_v24 = vadd.f32 %v1160_v50, %v515_v42 }
0x1ada   : > { %v579_v9 = vadd.f32 %v1168_v14, %v547_v24 }
0x1adc   : > { %v611_v30 = vadd.f32 %v1176_v41, %v579_v9 }
0x1ade   : > { %v643_v38 = vadd.f32 %v1184_v3, %v611_v30 }
0x1ae0   : > { %v675_v25 = vadd.f32 %v1194_v32, %v643_v38 }
0x1ae2   : > { %v707_v49 = vadd.f32 %v686_v7, %v675_v25 }
0x1b5a   : > { %v698_v21 = vpop.xlane.xlu0 %697 }
0x1b5b   : > { %vm699_vm14 = vcmp.eq.f32.partialorder %v696_v16, %v698_v21  ;;  %v704_v48 = vcvt.f32.s32 %v698_v21 }
0x1b5c   : > { %v700_v27 = vsel %vm699_vm14, %v695_v26, inf }
0x1b5d   : > { %701 = vmin.xlane.f32.xlu0 %v700_v27  ;;  %v705_v45 = vshll.u32 %v704_v48, 16 }
0x1b5e   : > { %v194_v35 = vpop.xlane.xlu0 %193 }
0x1b5f   : > { %878 = vlog2.f32 %v194_v35 }
0x1b61   : > { %205 = vadd.xlane.f32.xlu0 %v204_v28 }
0x1b69   : > { %v879_v40 = vpop.eup %878 }
0x1b6a   : > { %v196_v43 = vmul.f32 0.6931472, %v879_v40 }
0x1b6c   : > { %v714_v53 = vadd.f32 %v196_v43, %v1064_v6 }
0x1b6e   : > { %v715_v47 = vmul.f32 16.0, %v714_v53 }
0x1b70   : > { %v716_v52 = vsub.f32 %v707_v49, %v715_v47 }
0x1bea   : > { %v702_v44 = vpop.xlane.xlu0 %701 }
0x1beb   : > { %v703_v15 = vcvt.f32.s32 %v702_v44 }
0x1bed   : > { %v706_v46 = vadd.s32 %v705_v45, %v703_v15 }
0x1bee   : > { %v206_v61 = vpop.xlane.xlu0 %205 }
0x1bef   : > { %vm708_vm15 = vcmp.eq.s32.totalorder %v706_v46, %v1090_v34  ;;  %v712_v50 = vsub.f32 %v206_v61, %v1064_v6 }
0x1bf0   : > { %v827_v14 = vsel %vm708_vm15, 1.0, %v947_v39 }
0x1bf1   : > { %v711_v41 = vmax.f32 %v679_v58, %v827_v14  ;;  %v713_v51 = vsub.f32 %v712_v50, %v196_v43 }
0x1bf3   : > { %v717_v3 = vmul.f32 %v713_v51, %v711_v41  ;;  %v720_v57 = vmul.f32 0.9, %v713_v51 }
0x1bf5   : > { %v718_v55 = vsub.f32 %v716_v52, %v717_v3 }
0x1bf7   : > { %v719_v56 = vmul.f32 0.00625, %v718_v55 }
0x1bf9   : > { %v721_v59 = vadd.f32 %v720_v57, %v719_v56 }
0x1bfb   : > { %v722_v6 = vsub.f32 0.0, %v721_v59 }
0x1bfd   : > { %724 = vst.msk [vmem:[%s176_s26] sm:$0xff] %vm723_vm0, %v722_v6 }
0x1bfe PF: > { %p12_p8 = scmp.ge.s32.totalorder %s986_s14, 5   ;;  %s1264_s9 = smov %s936_s10 }
0x1bff   : > { %s1265_s10 = smov %s940_s11  ;;  %s1266_s11 = smov %s996_s17 }
0x1c00   : > { %s1267_s12 = smov %s986_s14  ;;  %14 = sbr.rel (!%p12_p8) target bundleno = 3 (0x3), region = 71 }
0x1c07   :  { %744 = vsyncpa [#allocation3], 1 }
0x1c08   :  { %746 = vsyncpa [#allocation3 + $0x1], 1 }

</bundles_post_ra>
